<compile_context>
chip_gen: v5e
topology: v5e:2x2
jax: 0.10.0
libtpu: 0.0.40
codegen_flags: <defaults>
</compile_context>

<pallas_src>
import jax
import jax.numpy as jnp
import numpy as np
from jax import lax
from jax.experimental import pallas as pl
from jax.experimental.pallas import tpu as pltpu


# ---------------------------------------------------------------------------
# Kernel
# ---------------------------------------------------------------------------
def _fused_kernel(x_ref, cw_ref, cb_ref, w1_ref, b1_ref, w2_ref, b2_ref,
                  logits_ref, feat_ref):
    """WeightedAvgPooling + add_block + classifier for one batch block.

    x_ref:  (Bblk, HW, C) bf16      cw_ref: (C, C) bf16     cb_ref: (1, C) f32
    w1_ref: (C, P) bf16 (BN folded) b1_ref: (1, P) f32 (BN folded)
    w2_ref: (K, P) f32 (bf16 if K>1) b2_ref: (1, K) f32
    logits_ref: (Bblk, K) f32       feat_ref: (Bblk, P) f32
    """
    bblk, hw, c = x_ref.shape
    xb = x_ref[...]                                     # (Bblk, HW, C) bf16
    x2 = xb.reshape(bblk * hw, c)                       # (Bblk*HW, C)  bf16

    # 1x1 conv over all Bblk*HW spatial positions as one MXU matmul.
    z = jnp.dot(x2, cw_ref[...], preferred_element_type=jnp.float32)
    mask = jax.nn.sigmoid(z + cb_ref[...])              # (Bblk*HW, C) f32
    prod = (mask * x2.astype(jnp.float32)).reshape(bblk, hw, c)
    pooled = jnp.sum(prod, axis=1) * (1.0 / hw)         # (Bblk, C) f32

    # add_block: Linear (eval-mode BN folded into w1/b1) + LeakyReLU(0.1).
    h = jnp.dot(pooled.astype(jnp.bfloat16), w1_ref[...],
                preferred_element_type=jnp.float32) + b1_ref[...]
    feat = jnp.where(h >= 0, h, 0.1 * h)                # (Bblk, P) f32
    feat_ref[...] = feat.astype(feat_ref.dtype)

    # classifier: Linear(P -> K); w2 kept in PyTorch [K, P] layout.
    if w2_ref.shape[0] == 1:
        # K == 1: VPU lane reduction instead of a 1-column MXU matmul.
        logits = jnp.sum(feat * w2_ref[...].astype(jnp.float32),
                         axis=-1, keepdims=True)
    else:
        # K > 1: bf16 x bf16 MXU matmul (w2 pre-cast in the wrapper).
        logits = lax.dot_general(feat.astype(w2_ref.dtype), w2_ref[...],
                                 (((1,), (1,)), ((), ())),
                                 preferred_element_type=jnp.float32)
    logits_ref[...] = (logits + b2_ref[...]).astype(logits_ref.dtype)


# ---------------------------------------------------------------------------
# Sizing heuristics
# ---------------------------------------------------------------------------
def _mxu_m_target():
    """Target M dim for the conv1x1 matmul: v5e's MXU (4x128^2) saturates at
    M=128; v6e/v7x (2x256^2) want >= 256."""
    try:
        name = str(getattr(pltpu.get_tpu_info(), "chip_version", "")).lower()
        if "v5e" in name or "v5 lite" in name or "v5lite" in name or "v5_lite" in name:
            return 128
    except Exception:
        pass
    return 256


def _choose_bblk(B, HW, mxu_m):
    """Batch rows per grid step: a multiple of 8 that divides B (dense
    8-sublane output tiles), smallest such that Bblk*HW >= mxu_m, while
    preferring >= 2 grid steps so both v7x TensorCores get work."""
    cands = [b for b in range(8, B + 1, 8) if B % b == 0]
    if not cands:
        return B                      # B < 8 or no 8-multiple divisor
    multi = [b for b in cands if B // b >= 2]
    pool = multi if multi else cands  # keep >= 2 steps whenever possible
    for b in pool:
        if b * HW >= mxu_m:
            return b
    return pool[-1]


def _stage_vmem_bytes(Bblk, HW, C, P, K):
    """Explicit scoped-VMEM budget: single-buffered constant weights +
    double-buffered x/out blocks + the f32 z/mask/prod temporaries that
    materialize in VMEM (they are far past 64 vregs at real sizes)."""
    m = Bblk * HW
    bf16, f32 = 2, 4
    weights = (C * C + C * P) * bf16 + (C + P + K * P + K) * f32
    x_in = 2 * Bblk * HW * C * bf16                 # double-buffered input
    temps = 3 * m * C * f32 + Bblk * C * f32 + 2 * Bblk * P * f32
    outs = 2 * Bblk * (P + K) * f32                 # double-buffered outputs
    est = int((weights + x_in + temps + outs) * 1.25) + (2 << 20)
    # Stay under v7x's 64 MiB physical VMEM; floor at a sane minimum.
    return max(min(est, 56 << 20), 16 << 20)


# ---------------------------------------------------------------------------
# Wrappers
# ---------------------------------------------------------------------------
def _attr_class_block_fc_channels_last(x_bhwc, cw, cb, w1, b1,
                                       bn_scale, bn_shift, w2, b2):
    """x_bhwc: channels-last features [B, H, W, C] (or [B, HW, C])."""
    B = x_bhwc.shape[0]
    C = x_bhwc.shape[-1]
    HW = 1
    for d in x_bhwc.shape[1:-1]:
        HW *= d
    P = w1.shape[1]
    K = w2.shape[0]

    # MXU operands in bf16 (f32 accumulation); fold eval-mode BN into w1/b1.
    x = x_bhwc.reshape(B, HW, C).astype(jnp.bfloat16)
    cw_bf = cw.astype(jnp.bfloat16)
    cb_f = cb.astype(jnp.float32)
    w1_f = (w1 * bn_scale).astype(jnp.bfloat16)
    b1_f = (b1 * bn_scale + bn_shift).astype(jnp.float32)
    w2_f = w2.astype(jnp.bfloat16) if K > 1 else w2.astype(jnp.float32)
    b2_f = b2.astype(jnp.float32)

    Bblk = _choose_bblk(B, HW, _mxu_m_target())
    grid = (B // Bblk,)

    # Constant-index weight/bias blocks: single-buffered (index never changes,
    # double-buffering would just waste VMEM — 8 MiB for cw at C=2048).
    def const_spec(shape):
        return pl.BlockSpec(shape, lambda b: (0, 0),
                            pipeline_mode=pl.Buffered(1))

    logits, feat = pl.pallas_call(
        _fused_kernel,
        out_shape=(jax.ShapeDtypeStruct((B, K), jnp.float32),
                   jax.ShapeDtypeStruct((B, P), jnp.float32)),
        grid_spec=pltpu.PrefetchScalarGridSpec(
            num_scalar_prefetch=0,
            grid=grid,
            in_specs=[
                pl.BlockSpec((Bblk, HW, C), lambda b: (b, 0, 0)),  # x block
                const_spec((C, C)),     # conv1x1 weight
                const_spec((1, C)),     # conv1x1 bias
                const_spec((C, P)),     # add_block Linear weight (BN folded)
                const_spec((1, P)),     # add_block Linear bias   (BN folded)
                const_spec((K, P)),     # classifier weight (PyTorch [K, P])
                const_spec((1, K)),     # classifier bias
            ],
            out_specs=(pl.BlockSpec((Bblk, K), lambda b: (b, 0)),
                       pl.BlockSpec((Bblk, P), lambda b: (b, 0))),
        ),
        compiler_params=pltpu.CompilerParams(
            dimension_semantics=("parallel",),
            vmem_limit_bytes=_stage_vmem_bytes(Bblk, HW, C, P, K)),
    )(x, cw_bf, cb_f, w1_f, b1_f, w2_f, b2_f)
    return logits, feat


# Preferred entry for producers that already have channels-last features.
attr_class_block_fc_nhwc = jax.jit(_attr_class_block_fc_channels_last)


@jax.jit
def attr_class_block_fc(x_nchw, cw, cb, w1, b1, bn_scale, bn_shift, w2, b2):
    """Faithful-to-module entry: NCHW input.  Returns (logits[B,K], feat[B,P]).

    cw: conv1x1 weight [Cin, Cout]; w1: add_block Linear [Cin, P];
    w2: classifier Linear in PyTorch layout [K, P].
    """
    # Layout glue only: transpose + bf16 convert fuse into one HBM pass under
    # jit (the convert happens inside the channels-last wrapper).
    # TODO(synk): accept channels-last bf16 from the producer and call
    # attr_class_block_fc_nhwc directly to skip this HBM round trip.
    x = jnp.transpose(x_nchw, (0, 2, 3, 1))
    return _attr_class_block_fc_channels_last(
        x, cw, cb, w1, b1, bn_scale, bn_shift, w2, b2)


# ---------------------------------------------------------------------------
# Pure-JAX reference + test
# ---------------------------------------------------------------------------
def _reference(x_nchw, cw, cb, w1, b1, bn_scale, bn_shift, w2, b2):
    B, C, H, W = x_nchw.shape
    xm = jnp.transpose(x_nchw, (0, 2, 3, 1)).reshape(B, H * W, C)
    mask = jax.nn.sigmoid(jnp.einsum('bsc,cd->bsd', xm, cw) + cb)
    pooled = jnp.sum(mask * xm, axis=1) / (H * W)
    z = pooled @ w1 + b1
    z = z * bn_scale + bn_shift
    feat = jnp.where(z >= 0, z, 0.1 * z)
    logits = feat @ w2.T + b2
    return logits, feat


if __name__ == "__main__":
    # Small shapes consistent with the module (real model: C=2048, P=512, K=1).
    B, C, H, W = 16, 64, 8, 8        # input_dim = C, HW = 64
    P = 32                           # bottleneck_plane
    K = 1                            # class_num

    key = jax.random.PRNGKey(0)
    k_cw, k_w1, k_w2, k_x = jax.random.split(key, 4)

    # weights_init_kaiming / weights_init_classifier: normal(std=0.001), bias 0.
    cw = 0.001 * jax.random.normal(k_cw, (C, C), jnp.float32)   # conv1x1 [Cin, Cout]
    cb = jnp.zeros((1, C), jnp.float32)
    w1 = 0.001 * jax.random.normal(k_w1, (C, P), jnp.float32)   # Linear [in, out]
    b1 = jnp.zeros((1, P), jnp.float32)
    w2 = 0.001 * jax.random.normal(k_w2, (K, P), jnp.float32)   # classifier [out, in]
    b2 = jnp.zeros((1, K), jnp.float32)

    # BatchNorm1d(P) eval mode with default init/running stats, as scale/shift.
    eps = 1e-5
    gamma = jnp.ones((P,), jnp.float32)
    beta = jnp.zeros((P,), jnp.float32)
    running_mean = jnp.zeros((P,), jnp.float32)
    running_var = jnp.ones((P,), jnp.float32)
    inv_std = gamma / jnp.sqrt(running_var + eps)
    bn_scale = inv_std.reshape(1, P)
    bn_shift = (beta - running_mean * inv_std).reshape(1, P)

    x = jax.random.normal(k_x, (B, C, H, W), jnp.float32)

    logits, feat = attr_class_block_fc(
        x, cw, cb, w1, b1, bn_scale, bn_shift, w2, b2)
    jax.block_until_ready((logits, feat))

    ref_logits, ref_feat = _reference(
        x, cw, cb, w1, b1, bn_scale, bn_shift, w2, b2)
    # bf16 MXU operands (f32 accumulation) => loosened tolerances vs f32 ref.
    np.testing.assert_allclose(np.asarray(feat), np.asarray(ref_feat),
                               rtol=5e-2, atol=1e-5)
    np.testing.assert_allclose(np.asarray(logits), np.asarray(ref_logits),
                               rtol=5e-2, atol=1e-5)
    assert logits.shape == (B, K) and feat.shape == (B, P)

    print("KERNEL_OK")
</pallas_src>

<mosaic_0001>
module attributes {stable_mosaic.version = 11 : i64} {
  func.func @_fused_kernel(%arg0: i32, %arg1: memref<8x64x64xbf16, #tpu.memory_space<vmem>>, %arg2: memref<64x64xbf16, #tpu.memory_space<vmem>>, %arg3: memref<1x64xf32, #tpu.memory_space<vmem>>, %arg4: memref<64x32xbf16, #tpu.memory_space<vmem>>, %arg5: memref<1x32xf32, #tpu.memory_space<vmem>>, %arg6: memref<1x32xf32, #tpu.memory_space<vmem>>, %arg7: memref<1x1xf32, #tpu.memory_space<vmem>>, %arg8: memref<8x1xf32, #tpu.memory_space<vmem>>, %arg9: memref<8x32xf32, #tpu.memory_space<vmem>>) attributes {dimension_semantics = [#tpu.dimension_semantics<parallel>], iteration_bounds = array<i64: 2>, scalar_prefetch = 0 : i64, scratch_operands = 0 : i64, tpu.core_type = #tpu.core_type<tc>, window_params = [{transform_indices = @transform_0, window_bounds = array<i64: 8, 64, 64>}, {pipeline_mode = #tpu.pipeline_mode<synchronous>, transform_indices = @transform_1, window_bounds = array<i64: 64, 64>}, {pipeline_mode = #tpu.pipeline_mode<synchronous>, transform_indices = @transform_2, window_bounds = array<i64: 1, 64>}, {pipeline_mode = #tpu.pipeline_mode<synchronous>, transform_indices = @transform_3, window_bounds = array<i64: 64, 32>}, {pipeline_mode = #tpu.pipeline_mode<synchronous>, transform_indices = @transform_4, window_bounds = array<i64: 1, 32>}, {pipeline_mode = #tpu.pipeline_mode<synchronous>, transform_indices = @transform_5, window_bounds = array<i64: 1, 32>}, {pipeline_mode = #tpu.pipeline_mode<synchronous>, transform_indices = @transform_6, window_bounds = array<i64: 1, 1>}, {transform_indices = @transform_7, window_bounds = array<i64: 8, 1>}, {transform_indices = @transform_8, window_bounds = array<i64: 8, 32>}]} {
    %c0 = arith.constant 0 : index
    %c0_0 = arith.constant 0 : index
    %c0_1 = arith.constant 0 : index
    %0 = vector.load %arg1[%c0, %c0_0, %c0_1] : memref<8x64x64xbf16, #tpu.memory_space<vmem>>, vector<8x64x64xbf16>
    %1 = vector.shape_cast %0 : vector<8x64x64xbf16> to vector<512x64xbf16>
    %c0_2 = arith.constant 0 : index
    %c0_3 = arith.constant 0 : index
    %2 = vector.load %arg2[%c0_2, %c0_3] : memref<64x64xbf16, #tpu.memory_space<vmem>>, vector<64x64xbf16>
    %cst = arith.constant dense<0.000000e+00> : vector<512x64xf32>
    %3 = tpu.matmul %1, %2, %cst {dimension_numbers = #tpu.dot_dimension_numbers<[1], [0], [0], [1], [0, 0, 1, 1], [], []>} : vector<512x64xbf16>, vector<64x64xbf16>, vector<512x64xf32> -> vector<512x64xf32>
    %c0_4 = arith.constant 0 : index
    %c0_5 = arith.constant 0 : index
    %4 = vector.load %arg3[%c0_4, %c0_5] : memref<1x64xf32, #tpu.memory_space<vmem>>, vector<1x64xf32>
    %5 = vector.broadcast %4 : vector<1x64xf32> to vector<512x64xf32>
    %6 = arith.addf %3, %5 : vector<512x64xf32>
    %7 = arith.negf %6 : vector<512x64xf32>
    %8 = math.exp %7 : vector<512x64xf32>
    %cst_6 = arith.constant 1.000000e+00 : f32
    %9 = vector.broadcast %cst_6 : f32 to vector<512x64xf32>
    %10 = arith.addf %9, %8 : vector<512x64xf32>
    %11 = arith.divf %9, %10 : vector<512x64xf32>
    %12 = arith.extf %1 : vector<512x64xbf16> to vector<512x64xf32>
    %13 = arith.mulf %11, %12 : vector<512x64xf32>
    %14 = vector.shape_cast %13 : vector<512x64xf32> to vector<8x64x64xf32>
    %cst_7 = arith.constant dense<0.000000e+00> : vector<8x64xf32>
    %15 = vector.multi_reduction <add>, %14, %cst_7 [1] : vector<8x64x64xf32> to vector<8x64xf32>
    %cst_8 = arith.constant 1.562500e-02 : f32
    %16 = vector.broadcast %cst_8 : f32 to vector<8x64xf32>
    %17 = arith.mulf %15, %16 : vector<8x64xf32>
    %18 = arith.truncf %17 : vector<8x64xf32> to vector<8x64xbf16>
    %c0_9 = arith.constant 0 : index
    %c0_10 = arith.constant 0 : index
    %19 = vector.load %arg4[%c0_9, %c0_10] : memref<64x32xbf16, #tpu.memory_space<vmem>>, vector<64x32xbf16>
    %cst_11 = arith.constant dense<0.000000e+00> : vector<8x32xf32>
    %20 = tpu.matmul %18, %19, %cst_11 {dimension_numbers = #tpu.dot_dimension_numbers<[1], [0], [0], [1], [0, 0, 1, 1], [], []>} : vector<8x64xbf16>, vector<64x32xbf16>, vector<8x32xf32> -> vector<8x32xf32>
    %c0_12 = arith.constant 0 : index
    %c0_13 = arith.constant 0 : index
    %21 = vector.load %arg5[%c0_12, %c0_13] : memref<1x32xf32, #tpu.memory_space<vmem>>, vector<1x32xf32>
    %22 = vector.broadcast %21 : vector<1x32xf32> to vector<8x32xf32>
    %23 = arith.addf %20, %22 : vector<8x32xf32>
    %cst_14 = arith.constant 0.000000e+00 : f32
    %24 = vector.broadcast %cst_14 : f32 to vector<8x32xf32>
    %25 = arith.cmpf oge, %23, %24 : vector<8x32xf32>
    %cst_15 = arith.constant 1.000000e-01 : f32
    %26 = vector.broadcast %cst_15 : f32 to vector<8x32xf32>
    %27 = arith.mulf %26, %23 : vector<8x32xf32>
    %28 = arith.select %25, %23, %27 : vector<8x32xi1>, vector<8x32xf32>
    %c0_16 = arith.constant 0 : index
    %c0_17 = arith.constant 0 : index
    %29 = vector.load %arg9[%c0_16, %c0_17] : memref<8x32xf32, #tpu.memory_space<vmem>>, vector<8x32xf32>
    tpu.vector_store %arg9[%c0_16, %c0_17], %28 {strides = array<i32>} : memref<8x32xf32, #tpu.memory_space<vmem>>, vector<8x32xf32>,
    %c0_18 = arith.constant 0 : index
    %c0_19 = arith.constant 0 : index
    %30 = vector.load %arg6[%c0_18, %c0_19] : memref<1x32xf32, #tpu.memory_space<vmem>>, vector<1x32xf32>
    %31 = vector.broadcast %30 : vector<1x32xf32> to vector<8x32xf32>
    %32 = arith.mulf %28, %31 : vector<8x32xf32>
    %cst_20 = arith.constant dense<0.000000e+00> : vector<8xf32>
    %33 = vector.multi_reduction <add>, %32, %cst_20 [1] : vector<8x32xf32> to vector<8xf32>
    %34 = vector.shape_cast %33 : vector<8xf32> to vector<8x1xf32>
    %c0_21 = arith.constant 0 : index
    %c0_22 = arith.constant 0 : index
    %35 = vector.load %arg7[%c0_21, %c0_22] : memref<1x1xf32, #tpu.memory_space<vmem>>, vector<1x1xf32>
    %36 = vector.broadcast %35 : vector<1x1xf32> to vector<8x1xf32>
    %37 = arith.addf %34, %36 : vector<8x1xf32>
    %c0_23 = arith.constant 0 : index
    %c0_24 = arith.constant 0 : index
    %38 = vector.load %arg8[%c0_23, %c0_24] : memref<8x1xf32, #tpu.memory_space<vmem>>, vector<8x1xf32>
    tpu.vector_store %arg8[%c0_23, %c0_24], %37 {strides = array<i32>} : memref<8x1xf32, #tpu.memory_space<vmem>>, vector<8x1xf32>,
    return
  }
  func.func @transform_0(%arg0: i32) -> (i32, i32, i32) {
    %c0_i32 = arith.constant 0 : i32
    %c0_i32_0 = arith.constant 0 : i32
    %c0_i32_1 = arith.constant 0 : i32
    return %arg0, %c0_i32, %c0_i32_0 : i32, i32, i32
  }
  func.func @transform_1(%arg0: i32) -> (i32, i32) {
    %c0_i32 = arith.constant 0 : i32
    %c0_i32_0 = arith.constant 0 : i32
    %c0_i32_1 = arith.constant 0 : i32
    return %c0_i32, %c0_i32_0 : i32, i32
  }
  func.func @transform_2(%arg0: i32) -> (i32, i32) {
    %c0_i32 = arith.constant 0 : i32
    %c0_i32_0 = arith.constant 0 : i32
    %c0_i32_1 = arith.constant 0 : i32
    return %c0_i32, %c0_i32_0 : i32, i32
  }
  func.func @transform_3(%arg0: i32) -> (i32, i32) {
    %c0_i32 = arith.constant 0 : i32
    %c0_i32_0 = arith.constant 0 : i32
    %c0_i32_1 = arith.constant 0 : i32
    return %c0_i32, %c0_i32_0 : i32, i32
  }
  func.func @transform_4(%arg0: i32) -> (i32, i32) {
    %c0_i32 = arith.constant 0 : i32
    %c0_i32_0 = arith.constant 0 : i32
    %c0_i32_1 = arith.constant 0 : i32
    return %c0_i32, %c0_i32_0 : i32, i32
  }
  func.func @transform_5(%arg0: i32) -> (i32, i32) {
    %c0_i32 = arith.constant 0 : i32
    %c0_i32_0 = arith.constant 0 : i32
    %c0_i32_1 = arith.constant 0 : i32
    return %c0_i32, %c0_i32_0 : i32, i32
  }
  func.func @transform_6(%arg0: i32) -> (i32, i32) {
    %c0_i32 = arith.constant 0 : i32
    %c0_i32_0 = arith.constant 0 : i32
    %c0_i32_1 = arith.constant 0 : i32
    return %c0_i32, %c0_i32_0 : i32, i32
  }
  func.func @transform_7(%arg0: i32) -> (i32, i32) {
    %c0_i32 = arith.constant 0 : i32
    %c0_i32_0 = arith.constant 0 : i32
    return %arg0, %c0_i32 : i32, i32
  }
  func.func @transform_8(%arg0: i32) -> (i32, i32) {
    %c0_i32 = arith.constant 0 : i32
    %c0_i32_0 = arith.constant 0 : i32
    return %arg0, %c0_i32 : i32, i32
  }
}

</mosaic_0001>

<bundles_post_ra>
// kernel: attr_class_block_fc.1
= control target key start
LH: loop header
LB: loop body
LE: loop exit
PB: predicated region body
PF: predicated region fallthrough
CT: control target
= control target key end

     0   :  { %s5448_s0 = inlined_call_operand.vmem [shape: bf16[16,64,64], index: 0, kind: input, shape index: {}]   ;;  %s5449_s1 = inlined_call_operand.vmem [shape: bf16[64,64], index: 1, kind: input, shape index: {}]   ;;  %s5450_s2 = inlined_call_operand.vmem [shape: f32[1,64], index: 2, kind: input, shape index: {}]   ;;  %s5451_s3 = inlined_call_operand.vmem [shape: bf16[64,32], index: 3, kind: input, shape index: {}]   ;;  %s5452_s4 = inlined_call_operand.vmem [shape: f32[1,32], index: 4, kind: input, shape index: {}]   ;;  %s5453_s5 = inlined_call_operand.vmem [shape: f32[1,32], index: 5, kind: input, shape index: {}]   ;;  %s5454_s6 = inlined_call_operand.<no memory space> [shape: f32[1,1], index: 6, kind: input, shape index: {}]   ;;  %s5455_s7 = inlined_call_operand.vmem [shape: f32[16,1], index: 7, kind: output, shape index: {0}]   ;;  %s5456_s8 = inlined_call_operand.hbm [shape: f32[16,32], index: 8, kind: output, shape index: {1}]  }
   0x1   :  { %v14_v0 = vstv %s5454_s6 }
   0x2   :  { %15 = vst [vmem:[#allocation2] sm:$0x1] %v14_v0 }
   0x3   :  { %16 = vsyncpa [#allocation4], 0 }
   0x4   :  { %18 = vsyncpa [#allocation4 + $0x1], 0  ;;  %s3322_s29 = smov 0   ;;  %s3324_s30 = smov 0  }
   0x5   :  { %s3326_s9 = smov 0   ;;  %s3328_s10 = smov 0  }
   0x6 LB: > { %s3343_s6 = sadd.s32 4294967295, %s3272_s10   ;;  %s2586_s11 = sadd.s32 4294967294, %s3272_s10   ;;  %s3272_s10 = sphi %s3328_s10, %s5658_s10   ;;  %s3268_s9 = sphi %s3326_s9, %s5657_s9   ;;  %s3264_s30 = sphi %s3324_s30, %s5656_s30   ;;  %s3260_s29 = sphi %s3322_s29, %s5655_s29  }
   0x7   : > { %s3347_s12 = sadd.s32 1, %s3272_s10   ;;  %s209_s13 = sadd.s32 1, %s3268_s9 }
   0x8   : > { %s206_s14 = ssub.s32 %s3272_s10, %s3347_s12  ;;  %p219_p0 = scmp.ne.s32.totalorder %s3268_s9, %s3264_s30 }
   0x9   : > { %p207_p1 = scmp.eq.s32.totalorder %s206_s14, 0  ;;  %p220_p2 = scmp.eq.s32.totalorder %s3343_s6, 1 }
   0xa   : > { %p225_p3 = scmp.ne.s32.totalorder %s3264_s30, %s3260_s29  ;;  %p226_p4 = scmp.eq.s32.totalorder %s2586_s11, 1 }
   0xb   : > { %s3358_s15 = scalar_select %p207_p1, %s3268_s9, %s209_s13  }
   0xc   : > { %p3360_p5 = por %p220_p2, %p219_p0  ;;  %p3364_p6 = por %p226_p4, %p225_p3 }
   0xd   : > { %p2589_p7 = scmp.ge.s32.totalorder %s3272_s10, 1  ;;  %p272_p8 = scmp.lt.s32.totalorder %s3272_s10, 3 }
   0xf   : > { %p273_p9 = pnand %p2589_p7, %p272_p8 }
  0x10   : > { %s3374_s20 = sshll.u32 (!%p273_p9), %s3343_s6, 3  ;;  %s308_s19 = sand.u32 (!%p273_p9), 1, %s3264_s30  }
  0x11   : > { %276 = sbr.rel (%p273_p9) target bundleno = 800 (0x320), region = 48  ;;  %p312_p10 = scmp.lt.s32.totalorder (!%p273_p9), %s3374_s20, 15 }
  0x12   : > { %s3230_s24 = scalar_lea.hbm (!%p273_p9), %s5456_s8, 16 }
  0x16   : > { %v2892_v1 = vld [vmem:[%s5449_s1 + $0x18] sm:$0xff]  ;;  %v2891_v2 = vld [vmem:[%s5449_s1 + $0x10] sm:$0xff]  ;;  %s313_s23 = scalar_select %p312_p10, %s3374_s20, 15  ;;  %v2890_v3 = vld [vmem:[%s5449_s1 + $0x8] sm:$0xff]  ;;  %vm583_vm0 = vcmask 523264  }
  0x17   : > { %684 = vmatpush.bf16.msra.mxu0 %v2892_v1  ;;  %2897 = vmatpush.bf16.msra.mxu1 %v2892_v1  ;;  %v2889_v4 = vld [vmem:[%s5449_s1] sm:$0xff] }
  0x18   : > { %2898 = vmatpush.bf16.msra.mxu2 %v2892_v1  ;;  %2899 = vmatpush.bf16.msra.mxu3 %v2892_v1  ;;  %s2856_s26 = sshll.u32 %s313_s23, 5  ;;  %v3455_v35 = vld [vmem:[%s5450_s2] ss:$0 sm:$0xff]  ;;  %s2590_s23 = sshll.u32 %s308_s19, 3 }
  0x19   : > { %s3390_s14 = scalar_lea.vmem %s5448_s0, %s2856_s26  ;;  %s2498_s26 = scalar_lea.hbm %s5456_s8, %s3374_s20 }
  0x1a   : > { %v2857_v5 = vld [vmem:[%s3390_s14] sm:$0xff]  ;;  %v2871_v7 = vld [vmem:[%s3390_s14 + $0x70] sm:$0xff]  ;;  %v2880_v8 = vld [vmem:[%s3390_s14 + $0xb8] sm:$0xff]  ;;  %s310_s27 = scalar_lea.vmem [#allocation3], %s2590_s23  ;;  %s2502_s11 = sshll.u32 %s2498_s26, 4  ;;  %s2503_s11 = int_to_ptr.hbm [resolvable:$true] %s2502_s11 }
  0x1b   : > { %685 = vmatpush.bf16.msra.mxu0 %v2891_v2  ;;  %2900 = vmatpush.bf16.msra.mxu1 %v2891_v2  ;;  %v2865_v6 = vld [vmem:[%s3390_s14 + $0x40] sm:$0xff]  ;;  %v2858_v9 = vld [vmem:[%s3390_s14 + $0x8] sm:$0xff]  ;;  %v2872_v11 = vld [vmem:[%s3390_s14 + $0x78] sm:$0xff]  ;;  %s2500_s28 = sshll.u32 %s310_s27, 4  ;;  %s2485_s20 = scalar_lea.sflag [#allocation4], %s308_s19  ;;  %s2501_s28 = int_to_ptr.vmem [resolvable:$true] %s2500_s28 }
  0x1c   : > { %2901 = vmatpush.bf16.msra.mxu2 %v2891_v2  ;;  %2902 = vmatpush.bf16.msra.mxu3 %v2891_v2  ;;  %v2866_v10 = vld [vmem:[%s3390_s14 + $0x48] sm:$0xff]  ;;  %v2881_v12 = vld [vmem:[%s3390_s14 + $0xc0] sm:$0xff]  ;;  %v2859_v13 = vld [vmem:[%s3390_s14 + $0x10] sm:$0xff]  ;;  %s3224_s18 = sshra.s32 %s2503_s11, 4  ;;  %s3225_s18 = int_to_ptr.hbm [resolvable:$true] %s3224_s18 }
  0x1d   : > { %v2867_v14 = vld [vmem:[%s3390_s14 + $0x50] sm:$0xff]  ;;  %v2873_v15 = vld [vmem:[%s3390_s14 + $0x80] sm:$0xff]  ;;  %v2882_v16 = vld [vmem:[%s3390_s14 + $0xc8] sm:$0xff]  ;;  %s3226_s21 = scalar_lea.hbm %s3225_s18, 8  ;;  %p3231_p0 = scmp.lt.s32.totalorder %s3225_s18, %s5456_s8 }
  0x1e   : > { %v2860_v17 = vld [vmem:[%s3390_s14 + $0x18] sm:$0xff]  ;;  %v2874_v19 = vld [vmem:[%s3390_s14 + $0x88] sm:$0xff]  ;;  %v2883_v20 = vld [vmem:[%s3390_s14 + $0xd0] sm:$0xff]  ;;  %p3227_p11 = scmp.ne.s32.totalorder %s3225_s18, %s3226_s21  ;;  %p3232_p1 = scmp.lt.s32.totalorder %s3230_s24, %s3226_s21 }
  0x1f   : > { %686 = vmatpush.bf16.msra.mxu0 %v2890_v3  ;;  %2903 = vmatpush.bf16.msra.mxu1 %v2890_v3  ;;  %v2868_v18 = vld [vmem:[%s3390_s14 + $0x58] sm:$0xff]  ;;  %v2861_v21 = vld [vmem:[%s3390_s14 + $0x20] sm:$0xff]  ;;  %v2875_v23 = vld [vmem:[%s3390_s14 + $0x90] sm:$0xff] }
  0x20   : > { %2904 = vmatpush.bf16.msra.mxu2 %v2890_v3  ;;  %2905 = vmatpush.bf16.msra.mxu3 %v2890_v3  ;;  %v2869_v22 = vld [vmem:[%s3390_s14 + $0x60] sm:$0xff]  ;;  %v2884_v24 = vld [vmem:[%s3390_s14 + $0xd8] sm:$0xff]  ;;  %v2862_v25 = vld [vmem:[%s3390_s14 + $0x28] sm:$0xff]  ;;  %p3228_p12 = pnand %p3227_p11, %p3360_p5  ;;  %p3233_p2 = por %p3232_p1, %p3231_p0 }
  0x21   : > { %v2870_v26 = vld [vmem:[%s3390_s14 + $0x68] sm:$0xff]  ;;  %v2876_v27 = vld [vmem:[%s3390_s14 + $0x98] sm:$0xff]  ;;  %v2885_v28 = vld [vmem:[%s3390_s14 + $0xe0] sm:$0xff] }
  0x22   : > { %v2863_v29 = vld [vmem:[%s3390_s14 + $0x30] sm:$0xff]  ;;  %v2877_v30 = vld [vmem:[%s3390_s14 + $0xa0] sm:$0xff]  ;;  %v2886_v31 = vld [vmem:[%s3390_s14 + $0xe8] sm:$0xff]  ;;  %p3229_p13 = pneg %p3228_p12 }
  0x23   : > { %687 = vmatpush.bf16.msra.mxu0 %v2889_v4  ;;  %2906 = vmatpush.bf16.msra.mxu1 %v2889_v4  ;;  %v2864_v32 = vld [vmem:[%s3390_s14 + $0x38] sm:$0xff]  ;;  %v2878_v33 = vld [vmem:[%s3390_s14 + $0xa8] sm:$0xff]  ;;  %v2887_v34 = vld [vmem:[%s3390_s14 + $0xf0] sm:$0xff] }
  0x24   : > { %2907 = vmatpush.bf16.msra.mxu2 %v2889_v4  ;;  %2908 = vmatpush.bf16.msra.mxu3 %v2889_v4  ;;  %v2879_v38 = vld [vmem:[%s3390_s14 + $0xb0] sm:$0xff]  ;;  %v2888_v39 = vld [vmem:[%s3390_s14 + $0xf8] sm:$0xff]  ;;  %v3471_v62 = vld [vmem:[%s3390_s14] sm:$0xff]   ;;  %p3234_p3 = pnand %p3233_p2, %p3229_p13 }
  0x25   : > { %v3474_v63 = vld [vmem:[%s3390_s14 + $0x40] sm:$0xff]   ;;  %v3478_v2 = vld [vmem:[%s3390_s14 + $0x70] sm:$0xff]   ;;  %v3483_v4 = vld [vmem:[%s3390_s14 + $0xb8] sm:$0xff]  }
  0x26   : > { %2739 = vmatmul.msk.bf16.vlgmr.msra.gmra.mxu0 %vm583_vm0, %v2857_v5  ;;  %2747 = vmatmul.msk.bf16.vlgmr.msra.gmra.mxu1 %vm583_vm0, %v2865_v6 }
  0x27   : > { %2753 = vmatmul.msk.bf16.vlgmr.msra.gmra.mxu2 %vm583_vm0, %v2871_v7  ;;  %2762 = vmatmul.msk.bf16.vlgmr.msra.gmra.mxu3 %vm583_vm0, %v2880_v8 }
  0x36   : > { %2740 = vmatmul.msk.bf16.gmra.mxu0 %vm583_vm0, %v2858_v9  ;;  %2748 = vmatmul.msk.bf16.gmra.mxu1 %vm583_vm0, %v2866_v10  ;;  %v2065_v9 = vunpack.c.l.bf16 %v3471_v62  ;;  %v2081_v10 = vunpack.c.l.bf16 %v3474_v63 }
  0x37   : > { %2754 = vmatmul.msk.bf16.gmra.mxu2 %vm583_vm0, %v2872_v11  ;;  %2763 = vmatmul.msk.bf16.gmra.mxu3 %vm583_vm0, %v2881_v12 }
  0x46   : > { %2741 = vmatmul.msk.bf16.gmra.mxu0 %vm583_vm0, %v2859_v13  ;;  %2749 = vmatmul.msk.bf16.gmra.mxu1 %vm583_vm0, %v2867_v14  ;;  %v2093_v13 = vunpack.c.l.bf16 %v3478_v2  ;;  %v2111_v14 = vunpack.c.l.bf16 %v3483_v4 }
  0x47   : > { %2755 = vmatmul.msk.bf16.gmra.mxu2 %vm583_vm0, %v2873_v15  ;;  %2764 = vmatmul.msk.bf16.gmra.mxu3 %vm583_vm0, %v2882_v16 }
  0x56   : > { %2742 = vmatmul.msk.bf16.gmra.mxu0 %vm583_vm0, %v2860_v17  ;;  %2750 = vmatmul.msk.bf16.gmra.mxu1 %vm583_vm0, %v2868_v18 }
  0x57   : > { %2756 = vmatmul.msk.bf16.gmra.mxu2 %vm583_vm0, %v2874_v19  ;;  %2765 = vmatmul.msk.bf16.gmra.mxu3 %vm583_vm0, %v2883_v20  ;;  %v2066_v20 = vunpack.c.h.bf16 %v3471_v62 }
  0x66   : > { %2743 = vmatmul.msk.bf16.gmra.mxu0 %vm583_vm0, %v2861_v21  ;;  %2751 = vmatmul.msk.bf16.gmra.mxu1 %vm583_vm0, %v2869_v22 }
  0x67   : > { %2757 = vmatmul.msk.bf16.gmra.mxu2 %vm583_vm0, %v2875_v23  ;;  %2766 = vmatmul.msk.bf16.gmra.mxu3 %vm583_vm0, %v2884_v24 }
  0x76   : > { %2744 = vmatmul.msk.bf16.gmra.mxu0 %vm583_vm0, %v2862_v25  ;;  %2752 = vmatmul.msk.bf16.gmra.mxu1 %vm583_vm0, %v2870_v26 }
  0x77   : > { %2758 = vmatmul.msk.bf16.gmra.mxu2 %vm583_vm0, %v2876_v27  ;;  %2767 = vmatmul.msk.bf16.gmra.mxu3 %vm583_vm0, %v2885_v28 }
  0x86   : > { %2745 = vmatmul.msk.bf16.gmra.mxu0 %vm583_vm0, %v2863_v29 }
  0x87   : > { %2759 = vmatmul.msk.bf16.gmra.mxu2 %vm583_vm0, %v2877_v30  ;;  %2768 = vmatmul.msk.bf16.gmra.mxu3 %vm583_vm0, %v2886_v31 }
  0x96   : > { %2746 = vmatmul.msk.bf16.gmra.mxu0 %vm583_vm0, %v2864_v32 }
  0x97   : > { %2760 = vmatmul.msk.bf16.gmra.mxu2 %vm583_vm0, %v2878_v33  ;;  %2769 = vmatmul.msk.bf16.gmra.mxu3 %vm583_vm0, %v2887_v34 }
  0xa3   : > { %v689_v36 = vpop.f32.mrf.mxu0  ;;  %v729_v37 = vpop.f32.mrf.mxu1 }
  0xa4   : > { %v690_v40 = vadd.f32 %v3455_v35, %v689_v36  ;;  %v730_v41 = vadd.f32 %v3455_v35, %v729_v37 }
  0xa6   : > { %v2771_v42 = vmul.f32 -1.442695, %v690_v40  ;;  %v2787_v43 = vmul.f32 -1.442695, %v730_v41  ;;  %v2082_v41 = vunpack.c.h.bf16 %v3474_v63 }
  0xa7   : > { %2761 = vmatmul.msk.bf16.gmra.mxu2 %vm583_vm0, %v2879_v38  ;;  %2770 = vmatmul.msk.bf16.gmra.mxu3 %vm583_vm0, %v2888_v39 }
  0xa8   : > { %2952 = vpow2.f32 %v2771_v42 }
  0xa9   : > { %2954 = vpow2.f32 %v2787_v43 }
  0xaa   : > { %v759_v44 = vpop.f32.mrf.mxu2  ;;  %v804_v45 = vpop.f32.mrf.mxu3 }
  0xab   : > { %v760_v46 = vadd.f32 %v3455_v35, %v759_v44  ;;  %v805_v47 = vadd.f32 %v3455_v35, %v804_v45  ;;  %v691_v48 = vpop.f32.mrf.mxu0  ;;  %v731_v49 = vpop.f32.mrf.mxu1 }
  0xac   : > { %v692_v50 = vadd.f32 %v3455_v35, %v691_v48  ;;  %v732_v51 = vadd.f32 %v3455_v35, %v731_v49 }
  0xad   : > { %v2799_v52 = vmul.f32 -1.442695, %v760_v46  ;;  %v2817_v53 = vmul.f32 -1.442695, %v805_v47 }
  0xae   : > { %v2953_v54 = vpop.eup %2952  ;;  %v2772_v57 = vmul.f32 -1.442695, %v692_v50  ;;  %v2788_v59 = vmul.f32 -1.442695, %v732_v51 }
  0xaf   : > { %v2955_v55 = vpop.eup %2954  ;;  %v1041_v56 = vadd.f32 1.0, %v2953_v54  ;;  %2956 = vpow2.f32 %v2799_v52 }
  0xb0   : > { %v3467_v58 = vadd.f32 1.0, %v2955_v55  ;;  %2958 = vpow2.f32 %v2817_v53 }
  0xb1   : > { %2960 = vrcp.f32 %v1041_v56  ;;  %v1114_v19 = vand.u32 2147483647, %v1041_v56  ;;  %vm1110_vm1 = vweird.f32 %v1041_v56  ;;  %v1116_v21 = vand.u32 2147483648, %v1041_v56 }
  0xb2   : > { %2962 = vrcp.f32 %v3467_v58  ;;  %v761_v60 = vpop.f32.mrf.mxu2  ;;  %v806_v16 = vpop.f32.mrf.mxu3  ;;  %vm1350_vm2 = vweird.f32 %v3467_v58  ;;  %v1354_v29 = vand.u32 2147483647, %v3467_v58  ;;  %v1356_v32 = vand.u32 2147483648, %v3467_v58 }
  0xb3   : > { %2964 = vpow2.f32 %v2772_v57  ;;  %v762_v0 = vadd.f32 %v3455_v35, %v761_v60  ;;  %v694_v23 = vpop.f32.mrf.mxu0  ;;  %v807_v27 = vadd.f32 %v3455_v35, %v806_v16  ;;  %vm3513_vm4 = vcmp.eq.f32.partialorder %v1114_v19, 8.507059e+37  ;;  %v734_v51 = vpop.f32.mrf.mxu1 }
  0xb4   : > { %2966 = vpow2.f32 %v2788_v59  ;;  %v695_v33 = vadd.f32 %v3455_v35, %v694_v23  ;;  %v1117_v40 = vor.u32 1.1754944e-38, %v1116_v21  ;;  %vm3535_vm7 = vcmp.eq.f32.partialorder %v1354_v29, 8.507059e+37  ;;  %v3712_v29 = vld [vmem:[%s3390_s14 + $0x48] sm:$0xff]  }
  0xb5   : > { %v2957_v61 = vpop.eup %2956  ;;  %v2800_v15 = vmul.f32 -1.442695, %v762_v0  ;;  %v2818_v42 = vmul.f32 -1.442695, %v807_v27  ;;  %v1357_v48 = vor.u32 1.1754944e-38, %v1356_v32 }
  0xb6   : > { %v2959_v1 = vpop.eup %2958  ;;  %v3480_v3 = vadd.f32 1.0, %v2957_v61  ;;  %v2773_v50 = vmul.f32 -1.442695, %v695_v33 }
  0xb7   : > { %v3485_v5 = vpop.eup %2960  ;;  %v3487_v6 = vadd.f32 1.0, %v2959_v1 }
  0xb8   : > { %v3489_v7 = vpop.eup %2962  ;;  %v1106_v8 = vmul.f32 %v3485_v5, %v1041_v56  ;;  %2968 = vrcp.f32 %v3480_v3  ;;  %vm1111_vm3 = vweird.f32 %v3485_v5  ;;  %v1536_v37 = vand.u32 2147483648, %v3480_v3 }
  0xb9   : > { %v2965_v11 = vpop.eup %2964  ;;  %v1346_v12 = vmul.f32 %v3489_v7, %v3467_v58  ;;  %2970 = vrcp.f32 %v3487_v6  ;;  %vm1351_vm5 = vweird.f32 %v3489_v7  ;;  %vm3528_vm6 = vmor %vm1110_vm1, %vm1111_vm3  ;;  %vm1530_vm9 = vweird.f32 %v3480_v3 }
  0xba   : > { %v2967_v17 = vpop.eup %2966  ;;  %v1107_v18 = vsub.f32 1.0, %v1106_v8  ;;  %v3503_v25 = vadd.f32 1.0, %v2965_v11  ;;  %2972 = vpow2.f32 %v2800_v15  ;;  %vm3543_vm8 = vmor %vm1350_vm2, %vm1351_vm5  ;;  %v1534_v49 = vand.u32 2147483647, %v3480_v3 }
  0xbb   : > { %v1347_v22 = vsub.f32 1.0, %v1346_v12  ;;  %v3505_v26 = vadd.f32 1.0, %v2967_v17  ;;  %v3552_v54 = vor.u32 1.1754944e-38, %v1536_v37  ;;  %v1804_v55 = vand.u32 2147483647, %v3487_v6 }
  0xbc   : > { %v1108_v24 = vmul.f32 %v3485_v5, %v1107_v18  ;;  %2974 = vrcp.f32 %v3503_v25  ;;  %v3556_v56 = vadd.f32 %v3455_v35, %v734_v51  ;;  %vm1125_vm10 = vweird.f32 %v3503_v25 }
  0xbd   : > { %v1348_v28 = vmul.f32 %v3489_v7, %v1347_v22  ;;  %2976 = vrcp.f32 %v3505_v26  ;;  %vm1800_vm11 = vweird.f32 %v3487_v6  ;;  %v1129_v1 = vand.u32 2147483647, %v3503_v25 }
  0xbe   : > { %v3511_v30 = vpop.eup %2968  ;;  %v1109_v34 = vadd.f32 %v3485_v5, %v1108_v24  ;;  %2978 = vpow2.f32 %v2818_v42  ;;  %v1131_v11 = vand.u32 2147483648, %v3503_v25  ;;  %vm3573_vm13 = vcmp.eq.f32.partialorder %v1534_v49, 8.507059e+37 }
  0xbf   : > { %v1526_v36 = vmul.f32 %v3511_v30, %v3480_v3  ;;  %v3525_v38 = vpop.eup %2970  ;;  %v1349_v43 = vadd.f32 %v3489_v7, %v1348_v28  ;;  %vm1531_vm12 = vweird.f32 %v3511_v30  ;;  %v1369_v16 = vand.u32 2147483647, %v3505_v26 }
  0xc0   : > { %v1796_v46 = vmul.f32 %v3525_v38, %v3487_v6  ;;  %v2973_v52 = vpop.eup %2972  ;;  %v1113_v53 = vsel %vm3528_vm6, %v3485_v5, %v1109_v34  ;;  %vm1365_vm15 = vweird.f32 %v3505_v26  ;;  %v1371_v19 = vand.u32 2147483648, %v3505_v26  ;;  %vm3604_vm5 = vmor %vm1530_vm9, %vm1531_vm12 }
  0xc1   : > { %v1527_v45 = vsub.f32 1.0, %v1526_v36  ;;  %v3560_v59 = vadd.f32 1.0, %v2973_v52  ;;  %v1353_v60 = vsel %vm3543_vm8, %v3489_v7, %v1349_v43  ;;  %v1118_v8 = vsel %vm3513_vm4, %v1117_v40, %v1113_v53 }
  0xc2   : > { %v2975_v57 = vpop.eup %2974  ;;  %v1797_v61 = vsub.f32 1.0, %v1796_v46  ;;  %v1358_v17 = vsel %vm3535_vm7, %v1357_v48, %v1353_v60  ;;  %v2129_v27 = vmul.f32 %v2065_v9, %v1118_v8  ;;  %vm1801_vm2 = vweird.f32 %v3525_v38  ;;  %v764_v46 = vpop.f32.mrf.mxu2 }
  0xc3   : > { %v1528_v58 = vmul.f32 %v3511_v30, %v1527_v45  ;;  %v1121_v0 = vmul.f32 %v2975_v57, %v3503_v25  ;;  %v2977_v5 = vpop.eup %2976  ;;  %2980 = vrcp.f32 %v3560_v59  ;;  %vm1126_vm14 = vweird.f32 %v2975_v57  ;;  %vm3651_vm9 = vmor %vm1800_vm11, %vm1801_vm2 }
  0xc4   : > { %v1361_v15 = vmul.f32 %v2977_v5, %v3505_v26  ;;  %v1798_v21 = vmul.f32 %v3525_v38, %v1797_v61  ;;  %vm1366_vm1 = vweird.f32 %v2977_v5  ;;  %v2979_v24 = vpop.eup %2978  ;;  %vm3590_vm3 = vmor %vm1125_vm10, %vm1126_vm14  ;;  %vm3594_vm4 = vcmp.eq.f32.partialorder %v1129_v1, 8.507059e+37 }
  0xc5   : > { %v1122_v7 = vsub.f32 1.0, %v1121_v0  ;;  %v1529_v18 = vadd.f32 %v3511_v30, %v1528_v58  ;;  %v1132_v31 = vor.u32 1.1754944e-38, %v1131_v11  ;;  %v2145_v32 = vmul.f32 %v2081_v10, %v1358_v17  ;;  %vm3619_vm7 = vmor %vm1365_vm15, %vm1366_vm1  ;;  %v809_v58 = vpop.f32.mrf.mxu3 }
  0xc6   : > { %v1362_v23 = vsub.f32 1.0, %v1361_v15  ;;  %vm3608_vm6 = vcmp.eq.f32.partialorder %v1369_v16, 8.507059e+37  ;;  %v1372_v37 = vor.u32 1.1754944e-38, %v1371_v19  ;;  %v3623_v39 = vadd.f32 1.0, %v2979_v24  ;;  %v696_v16 = vpop.f32.mrf.mxu0 }
  0xc7   : > { %v1123_v22 = vmul.f32 %v2975_v57, %v1122_v7  ;;  %v1533_v10 = vsel %vm3604_vm5, %v3511_v30, %v1529_v18  ;;  %2982 = vpow2.f32 %v2773_v50  ;;  %v1799_v40 = vadd.f32 %v3525_v38, %v1798_v21 }
  0xc8   : > { %v1363_v33 = vmul.f32 %v2977_v5, %v1362_v23  ;;  %vm3630_vm8 = vcmp.eq.f32.partialorder %v1804_v55, 8.507059e+37  ;;  %v1806_v26 = vand.u32 2147483648, %v3487_v6  ;;  %2984 = vrcp.f32 %v3623_v39 }
  0xc9   : > { %v1124_v25 = vadd.f32 %v2975_v57, %v1123_v22  ;;  %v3612_v36 = vpop.eup %2980  ;;  %v2193_v47 = vsel %vm583_vm0, %v2129_v27, 0.0  ;;  %v2235_v51 = vsel %vm583_vm0, %v2145_v32, 0.0  ;;  %v1538_v52 = vsel %vm3573_vm13, %v3552_v54, %v1533_v10  ;;  %v3695_v22 = vld [vmem:[%s3390_s14 + $0x8] sm:$0xff]  }
  0xca   : > { %v1364_v43 = vadd.f32 %v2977_v5, %v1363_v33  ;;  %v1541_v44 = vmul.f32 %v3612_v36, %v3560_v59  ;;  %v1803_v55 = vsel %vm3651_vm9, %v3525_v38, %v1799_v40  ;;  %v1807_v61 = vor.u32 1.1754944e-38, %v1806_v26  ;;  %v766_v32 = vpop.f32.mrf.mxu2  ;;  %v736_v33 = vpop.f32.mrf.mxu1 }
  0xcb   : > { %v1128_v42 = vsel %vm3590_vm3, %v2975_v57, %v1124_v25  ;;  %v765_v1 = vadd.f32 %v3455_v35, %v764_v46  ;;  %v810_v7 = vadd.f32 %v3455_v35, %v809_v58  ;;  %vm1546_vm10 = vweird.f32 %v3612_v36  ;;  %v3734_v46 = vld [vmem:[%s3390_s14 + $0xc0] sm:$0xff]  }
  0xcc   : > { %v1133_v45 = vsel %vm3594_vm4, %v1132_v31, %v1128_v42  ;;  %v1368_v49 = vsel %vm3619_vm7, %v2977_v5, %v1364_v43  ;;  %v1542_v50 = vsub.f32 1.0, %v1541_v44  ;;  %v1549_v5 = vand.u32 2147483647, %v3560_v59 }
  0xcd   : > { %v2130_v48 = vmul.f32 %v2066_v20, %v1133_v45  ;;  %v1373_v62 = vsel %vm3608_vm6, %v1372_v37, %v1368_v49  ;;  %v2789_v20 = vmul.f32 -1.442695, %v3556_v56  ;;  %v2983_v60 = vpop.eup %2982  ;;  %v2157_v56 = vmul.f32 %v2093_v13, %v1538_v52  ;;  %v3731_v45 = vld [vmem:[%s3390_s14 + $0x78] sm:$0xff]  }
  0xce   : > { %v2146_v54 = vmul.f32 %v2082_v41, %v1373_v62  ;;  %v1543_v6 = vmul.f32 %v3612_v36, %v1542_v50  ;;  %v3672_v8 = vadd.f32 1.0, %v2983_v60  ;;  %v3674_v63 = vpop.eup %2984  ;;  %v1808_v41 = vsel %vm3630_vm8, %v1807_v61, %v1803_v55 }
  0xcf   : > { %v2194_v57 = vsel %vm583_vm0, %v2130_v48, 0.0  ;;  %2986 = vpow2.f32 %v2789_v20  ;;  %v2801_v12 = vmul.f32 -1.442695, %v765_v1  ;;  %v1811_v13 = vmul.f32 %v3674_v63, %v3623_v39 }
  0xd0   : > { %v3665_v0 = vadd.f32 %v2194_v57, %v2193_v47  ;;  %v2236_v38 = vsel %vm583_vm0, %v2146_v54, 0.0  ;;  %v1544_v15 = vadd.f32 %v3612_v36, %v1543_v6  ;;  %2988 = vrcp.f32 %v3672_v8 }
  0xd1   : > { %v3678_v11 = vadd.f32 %v2236_v38, %v2235_v51  ;;  %vm1545_vm11 = vweird.f32 %v3560_v59  ;;  %v1551_v17 = vand.u32 2147483648, %v3560_v59  ;;  %v2094_v18 = vunpack.c.h.bf16 %v3478_v2 }
  0xd2   : > { %vm3689_vm12 = vcmp.eq.f32.partialorder %v1549_v5, 8.507059e+37  ;;  %v2112_v21 = vunpack.c.h.bf16 %v3483_v4  ;;  %2990 = vpow2.f32 %v2801_v12  ;;  %v2819_v23 = vmul.f32 -1.442695, %v810_v7  ;;  %vm3706_vm13 = vmor %vm1545_vm11, %vm1546_vm10 }
  0xd3   : > { %v3698_v27 = vsel %vm583_vm0, %v2157_v56, 0.0  ;;  %v3702_v28 = vmul.f32 %v2111_v14, %v1808_v41  ;;  %v1821_v59 = vand.u32 2147483648, %v3623_v39  ;;  %v697_v31 = vadd.f32 %v3455_v35, %v696_v16 }
  0xd4   : > { %v1548_v9 = vsel %vm3706_vm13, %v3612_v36, %v1544_v15  ;;  %v1812_v25 = vsub.f32 1.0, %v1811_v13  ;;  %2992 = vpow2.f32 %v2819_v23  ;;  %v1552_v34 = vor.u32 1.1754944e-38, %v1551_v17  ;;  %v811_v13 = vpop.f32.mrf.mxu3 }
  0xd5   : > { %v2987_v24 = vpop.eup %2986  ;;  %v2067_v10 = vunpack.c.l.bf16 %v3695_v22  ;;  %v2774_v3 = vmul.f32 -1.442695, %v697_v31  ;;  %v737_v37 = vadd.f32 %v3455_v35, %v736_v33  ;;  %vm1815_vm14 = vweird.f32 %v3623_v39 }
  0xd6   : > { %v3718_v14 = vadd.f32 1.0, %v2987_v24  ;;  %v2989_v40 = vpop.eup %2988  ;;  %v1819_v42 = vand.u32 2147483647, %v3623_v39  ;;  %v2083_v36 = vunpack.c.l.bf16 %v3712_v29  ;;  %v767_v43 = vadd.f32 %v3455_v35, %v766_v32 }
  0xd7   : > { %v1553_v44 = vsel %vm3689_vm12, %v1552_v34, %v1548_v9  ;;  %v1822_v30 = vor.u32 1.1754944e-38, %v1821_v59  ;;  %v1136_v26 = vmul.f32 %v2989_v40, %v3672_v8  ;;  %v1813_v48 = vmul.f32 %v3674_v63, %v1812_v25 }
  0xd8   : > { %2994 = vrcp.f32 %v3718_v14  ;;  %v2991_v47 = vpop.eup %2990  ;;  %vm1140_vm15 = vweird.f32 %v3672_v8  ;;  %v1146_v49 = vand.u32 2147483648, %v3672_v8  ;;  %v2790_v50 = vmul.f32 -1.442695, %v737_v37 }
  0xd9   : > { %2996 = vpow2.f32 %v2774_v3  ;;  %v1137_v51 = vsub.f32 1.0, %v1136_v26  ;;  %vm1141_vm1 = vweird.f32 %v2989_v40  ;;  %v1144_v52 = vand.u32 2147483647, %v3672_v8 }
  0xda   : > { %v3740_v53 = vadd.f32 1.0, %v2991_v47  ;;  %v2993_v62 = vpop.eup %2992  ;;  %vm3742_vm2 = vcmp.eq.f32.partialorder %v1819_v42, 8.507059e+37  ;;  %v2095_v55 = vunpack.c.l.bf16 %v3731_v45  ;;  %v2113_v57 = vunpack.c.l.bf16 %v3734_v46  ;;  %vm3754_vm4 = vmor %vm1140_vm15, %vm1141_vm1 }
  0xdb   : > { %2998 = vpow2.f32 %v2790_v50  ;;  %v2802_v54 = vmul.f32 -1.442695, %v767_v43  ;;  %v2158_v6 = vmul.f32 %v2094_v18, %v1553_v44  ;;  %vm1816_vm3 = vweird.f32 %v3674_v63 }
  0xdc   : > { %v1138_v58 = vmul.f32 %v2989_v40, %v1137_v51  ;;  %3000 = vrcp.f32 %v3740_v53  ;;  %v1814_v61 = vadd.f32 %v3674_v63, %v1813_v48  ;;  %v1147_v56 = vor.u32 1.1754944e-38, %v1146_v49  ;;  %vm3774_vm7 = vmor %vm1815_vm14, %vm1816_vm3 }
  0xdd   : > { %v3758_v38 = vadd.f32 1.0, %v2993_v62  ;;  %3002 = vpow2.f32 %v2802_v54  ;;  %vm3760_vm5 = vcmp.eq.f32.partialorder %v1144_v52, 8.507059e+37  ;;  %v2068_v15 = vunpack.c.h.bf16 %v3695_v22 }
  0xde   : > { %v2995_v60 = vpop.eup %2994  ;;  %v1139_v41 = vadd.f32 %v2989_v40, %v1138_v58  ;;  %vm1380_vm6 = vweird.f32 %v3718_v14  ;;  %v1384_v8 = vand.u32 2147483647, %v3718_v14  ;;  %v1386_v16 = vand.u32 2147483648, %v3718_v14 }
  0xdf   : > { %v2997_v5 = vpop.eup %2996  ;;  %v1376_v7 = vmul.f32 %v2995_v60, %v3718_v14  ;;  %3004 = vrcp.f32 %v3758_v38  ;;  %vm1381_vm8 = vweird.f32 %v2995_v60  ;;  %v3783_v2 = vsel %vm583_vm0, %v2158_v6, 0.0 }
  0xe0   : > { %v1143_v18 = vsel %vm3754_vm4, %v2989_v40, %v1139_v41  ;;  %v3780_v23 = vadd.f32 1.0, %v2997_v5  ;;  %v1818_v59 = vsel %vm3774_vm7, %v3674_v63, %v1814_v61  ;;  %v812_v31 = vadd.f32 %v3455_v35, %v811_v13  ;;  %vm3797_vm9 = vmor %vm1380_vm6, %vm1381_vm8  ;;  %v699_v5 = vpop.f32.mrf.mxu0 }
  0xe1   : > { %v1377_v19 = vsub.f32 1.0, %v1376_v7  ;;  %v2999_v24 = vpop.eup %2998  ;;  %v1148_v39 = vsel %vm3760_vm5, %v1147_v56, %v1143_v18  ;;  %v1566_v33 = vand.u32 2147483648, %v3740_v53  ;;  %vm3801_vm10 = vcmp.eq.f32.partialorder %v1384_v8, 8.507059e+37 }
  0xe2   : > { %v3791_v32 = vpop.eup %3000  ;;  %v2131_v9 = vmul.f32 %v2067_v10, %v1148_v39  ;;  %3006 = vrcp.f32 %v3780_v23  ;;  %v1387_v37 = vor.u32 1.1754944e-38, %v1386_v16  ;;  %v2084_v40 = vunpack.c.h.bf16 %v3712_v29 }
  0xe3   : > { %v1378_v25 = vmul.f32 %v2995_v60, %v1377_v19  ;;  %v3003_v34 = vpop.eup %3002  ;;  %v1556_v10 = vmul.f32 %v3791_v32, %v3740_v53  ;;  %v3810_v42 = vsel %vm3742_vm2, %v1822_v30, %v1818_v59  ;;  %v3813_v44 = vadd.f32 1.0, %v2999_v24 }
  0xe4   : > { %v2196_v14 = vsel %vm583_vm0, %v2131_v9, 0.0  ;;  %v1564_v49 = vand.u32 2147483647, %v3740_v53  ;;  %v3821_v50 = vadd.f32 1.0, %v3003_v34  ;;  %vm1560_vm11 = vweird.f32 %v3740_v53 }
  0xe5   : > { %v1379_v43 = vadd.f32 %v2995_v60, %v1378_v25  ;;  %v3815_v26 = vpop.eup %3004  ;;  %v3818_v47 = vadd.f32 %v2196_v14, %v3665_v0  ;;  %v1557_v48 = vsub.f32 1.0, %v1556_v10  ;;  %v3826_v30 = vor.u32 1.1754944e-38, %v1566_v33 }
  0xe6   : > { %v1826_v52 = vmul.f32 %v3815_v26, %v3758_v38  ;;  %vm1830_vm12 = vweird.f32 %v3758_v38  ;;  %v1834_v62 = vand.u32 2147483647, %v3758_v38  ;;  %v1836_v20 = vand.u32 2147483648, %v3758_v38 }
  0xe7   : > { %v1383_v51 = vsel %vm3797_vm9, %v2995_v60, %v1379_v43  ;;  %3008 = vrcp.f32 %v3813_v44  ;;  %v1558_v58 = vmul.f32 %v3791_v32, %v1557_v48  ;;  %v2820_v61 = vmul.f32 -1.442695, %v812_v31  ;;  %v739_v48 = vpop.f32.mrf.mxu1 }
  0xe8   : > { %v1388_v0 = vsel %vm3801_vm10, %v1387_v37, %v1383_v51  ;;  %v3007_v54 = vpop.eup %3006  ;;  %v1827_v60 = vsub.f32 1.0, %v1826_v52  ;;  %vm1155_vm13 = vweird.f32 %v3780_v23  ;;  %v1159_v56 = vand.u32 2147483647, %v3780_v23  ;;  %v701_v59 = vpop.f32.mrf.mxu0 }
  0xe9   : > { %v2147_v6 = vmul.f32 %v2083_v36, %v1388_v0  ;;  %v1151_v1 = vmul.f32 %v3007_v54, %v3780_v23  ;;  %3010 = vrcp.f32 %v3821_v50  ;;  %v1161_v7 = vand.u32 2147483648, %v3780_v23  ;;  %v3973_v23 = vld [vmem:[%s3390_s14 + $0x80] sm:$0xff]  }
  0xea   : > { %v1828_v12 = vmul.f32 %v3815_v26, %v1827_v60  ;;  %v1399_v36 = vand.u32 2147483647, %v3813_v44  ;;  %vm1156_vm14 = vweird.f32 %v3007_v54  ;;  %v1401_v16 = vand.u32 2147483648, %v3813_v44  ;;  %v814_v60 = vpop.f32.mrf.mxu3 }
  0xeb   : > { %v2238_v41 = vsel %vm583_vm0, %v2147_v6, 0.0  ;;  %v1152_v8 = vsub.f32 1.0, %v1151_v1  ;;  %v1559_v17 = vadd.f32 %v3791_v32, %v1558_v58  ;;  %vm1561_vm15 = vweird.f32 %v3791_v32  ;;  %vm3870_vm5 = vmor %vm1155_vm13, %vm1156_vm14 }
  0xec   : > { %v3848_v13 = vadd.f32 %v2238_v41, %v3678_v11  ;;  %vm3853_vm1 = vcmp.eq.f32.partialorder %v1834_v62, 8.507059e+37  ;;  %v700_v19 = vadd.f32 %v3455_v35, %v699_v5  ;;  %vm3858_vm2 = vcmp.eq.f32.partialorder %v1564_v49, 8.507059e+37  ;;  %vm3881_vm6 = vmor %vm1560_vm11, %vm1561_vm15  ;;  %v769_v62 = vpop.f32.mrf.mxu2 }
  0xed   : > { %v3009_v24 = vpop.eup %3008  ;;  %v1837_v11 = vor.u32 1.1754944e-38, %v1836_v20  ;;  %v1153_v39 = vmul.f32 %v3007_v54, %v1152_v8  ;;  %vm3862_vm3 = vcmp.eq.f32.partialorder %v1159_v56, 8.507059e+37  ;;  %3012 = vpow2.f32 %v2820_v61 }
  0xee   : > { %v1829_v9 = vadd.f32 %v3815_v26, %v1828_v12  ;;  %vm1831_vm4 = vweird.f32 %v3815_v26  ;;  %v1162_v33 = vor.u32 1.1754944e-38, %v1161_v7  ;;  %v1391_v34 = vmul.f32 %v3009_v24, %v3813_v44 }
  0xef   : > { %v3875_v3 = vpop.eup %3010  ;;  %v1154_v37 = vadd.f32 %v3007_v54, %v1153_v39  ;;  %vm1395_vm7 = vweird.f32 %v3813_v44  ;;  %vm3886_vm8 = vcmp.eq.f32.partialorder %v1399_v36, 8.507059e+37  ;;  %v1402_v10 = vor.u32 1.1754944e-38, %v1401_v16  ;;  %vm3899_vm10 = vmor %vm1830_vm12, %vm1831_vm4 }
  0xf0   : > { %v1563_v14 = vsel %vm3881_vm6, %v3791_v32, %v1559_v17  ;;  %v1392_v43 = vsub.f32 1.0, %v1391_v34  ;;  %vm1396_vm9 = vweird.f32 %v3009_v24  ;;  %v1571_v53 = vmul.f32 %v3875_v3, %v3821_v50 }
  0xf1   : > { %v1158_v51 = vsel %vm3870_vm5, %v3007_v54, %v1154_v37  ;;  %v1579_v52 = vand.u32 2147483647, %v3821_v50  ;;  %v2775_v32 = vmul.f32 -1.442695, %v700_v19  ;;  %v740_v0 = vadd.f32 %v3455_v35, %v739_v48  ;;  %vm3917_vm11 = vmor %vm1395_vm7, %vm1396_vm9 }
  0xf2   : > { %v1833_v20 = vsel %vm3899_vm10, %v3815_v26, %v1829_v9  ;;  %v1163_v38 = vsel %vm3862_vm3, %v1162_v33, %v1158_v51  ;;  %v1393_v6 = vmul.f32 %v3009_v24, %v1392_v43  ;;  %v1572_v58 = vsub.f32 1.0, %v1571_v53  ;;  %v3960_v33 = vld [vmem:[%s3390_s14 + $0x50] sm:$0xff]  }
  0xf3   : > { %v3013_v61 = vpop.eup %3012  ;;  %v2132_v54 = vmul.f32 %v2068_v15, %v1163_v38  ;;  %v1581_v56 = vand.u32 2147483648, %v3821_v50  ;;  %3014 = vpow2.f32 %v2775_v32  ;;  %v2791_v26 = vmul.f32 -1.442695, %v740_v0  ;;  %v741_v32 = vpop.f32.mrf.mxu1 }
  0xf4   : > { %v1394_v5 = vadd.f32 %v3009_v24, %v1393_v6  ;;  %v1573_v41 = vmul.f32 %v3875_v3, %v1572_v58  ;;  %v3923_v12 = vadd.f32 1.0, %v3013_v61  ;;  %v770_v7 = vadd.f32 %v3455_v35, %v769_v62 }
  0xf5   : > { %v1838_v22 = vsel %vm3853_vm1, %v1837_v11, %v1833_v20  ;;  %v2198_v15 = vsel %vm583_vm0, %v2132_v54, 0.0  ;;  %3016 = vpow2.f32 %v2791_v26  ;;  %v815_v44 = vadd.f32 %v3455_v35, %v814_v60 }
  0xf6   : > { %v1568_v36 = vsel %vm3858_vm2, %v3826_v30, %v1563_v14  ;;  %v3934_v8 = vadd.f32 %v2198_v15, %v3818_v47  ;;  %v1398_v16 = vsel %vm3917_vm11, %v3009_v24, %v1394_v5  ;;  %3018 = vrcp.f32 %v3923_v12 }
  0xf7   : > { %v1574_v17 = vadd.f32 %v3875_v3, %v1573_v41  ;;  %vm1575_vm12 = vweird.f32 %v3821_v50  ;;  %vm1576_vm13 = vweird.f32 %v3875_v3  ;;  %v2096_v18 = vunpack.c.h.bf16 %v3731_v45  ;;  %v4428_v45 = vld [vmem:[%s3390_s14 + $0x60] sm:$0xff]  }
  0xf8   : > { %v2177_v30 = vmul.f32 %v2113_v57, %v1838_v22  ;;  %v1403_v47 = vsel %vm3886_vm8, %v1402_v10, %v1398_v16  ;;  %v2803_v19 = vmul.f32 -1.442695, %v770_v7  ;;  %v2821_v24 = vmul.f32 -1.442695, %v815_v44  ;;  %v3957_v57 = vld [vmem:[%s3390_s14 + $0x10] sm:$0xff]   ;;  %vm3964_vm15 = vmor %vm1575_vm12, %vm1576_vm13 }
  0xf9   : > { %v3015_v11 = vpop.eup %3014  ;;  %v3949_v39 = vmul.f32 %v2095_v55, %v1568_v36  ;;  %vm3951_vm14 = vcmp.eq.f32.partialorder %v1579_v52, 8.507059e+37  ;;  %v1582_v9 = vor.u32 1.1754944e-38, %v1581_v56  ;;  %v2114_v25 = vunpack.c.h.bf16 %v3734_v46  ;;  %v3993_v52 = vld [vmem:[%s3390_s14 + $0xc8] sm:$0xff]  }
  0xfa   : > { %v1849_v55 = vand.u32 2147483647, %v3923_v12  ;;  %v1851_v63 = vand.u32 2147483648, %v3923_v12  ;;  %v3970_v37 = vadd.f32 1.0, %v3015_v11  ;;  %3020 = vpow2.f32 %v2803_v19 }
  0xfb   : > { %v3017_v10 = vpop.eup %3016  ;;  %v2148_v14 = vmul.f32 %v2084_v40, %v1403_v47  ;;  %v1578_v50 = vsel %vm3964_vm15, %v3875_v3, %v1574_v17  ;;  %3022 = vpow2.f32 %v2821_v24  ;;  %v702_v43 = vadd.f32 %v3455_v35, %v701_v59  ;;  %v771_v47 = vpop.f32.mrf.mxu2 }
  0xfc   : > { %v3019_v53 = vpop.eup %3018  ;;  %v3982_v48 = vsel %vm583_vm0, %v2177_v30, 0.0  ;;  %3024 = vrcp.f32 %v3970_v37  ;;  %v2069_v49 = vunpack.c.l.bf16 %v3957_v57  ;;  %v2085_v51 = vunpack.c.l.bf16 %v3960_v33  ;;  %v816_v24 = vpop.f32.mrf.mxu3 }
  0xfd   : > { %v1841_v29 = vmul.f32 %v3019_v53, %v3923_v12  ;;  %vm1845_vm1 = vweird.f32 %v3923_v12  ;;  %v3989_v40 = vadd.f32 1.0, %v3017_v10  ;;  %v2097_v3 = vunpack.c.l.bf16 %v3973_v23 }
  0xfe   : > { %v3997_v0 = vsel %vm3951_vm14, %v1582_v9, %v1578_v50  ;;  %vm3999_vm2 = vcmp.eq.f32.partialorder %v1849_v55, 8.507059e+37  ;;  %v2776_v20 = vmul.f32 -1.442695, %v702_v43  ;;  %v742_v38 = vadd.f32 %v3455_v35, %v741_v32 }
  0xff   : > { %v2240_v6 = vsel %vm583_vm0, %v2148_v14, 0.0  ;;  %v1842_v58 = vsub.f32 1.0, %v1841_v29  ;;  %v1852_v60 = vor.u32 1.1754944e-38, %v1851_v63  ;;  %3026 = vrcp.f32 %v3989_v40 }
 0x100   : > { %v3021_v61 = vpop.eup %3020  ;;  %v1174_v54 = vand.u32 2147483647, %v3970_v37  ;;  %v2115_v1 = vunpack.c.l.bf16 %v3993_v52  ;;  %3028 = vpow2.f32 %v2776_v20  ;;  %v2792_v56 = vmul.f32 -1.442695, %v742_v38 }
 0x101   : > { %v3023_v26 = vpop.eup %3022  ;;  %v1843_v5 = vmul.f32 %v3019_v53, %v1842_v58  ;;  %vm1846_vm3 = vweird.f32 %v3019_v53  ;;  %v1176_v41 = vand.u32 2147483648, %v3970_v37  ;;  %v4009_v7 = vadd.f32 1.0, %v3021_v61 }
 0x102   : > { %v3025_v22 = vpop.eup %3024  ;;  %v4012_v15 = vadd.f32 %v2240_v6, %v3848_v13  ;;  %v4014_v44 = vadd.f32 1.0, %v3023_v26  ;;  %v2070_v36 = vunpack.c.h.bf16 %v3957_v57  ;;  %3030 = vpow2.f32 %v2792_v56  ;;  %vm1847_vm4 = vmor %vm1845_vm1, %vm1846_vm3 }
 0x103   : > { %v1844_v16 = vadd.f32 %v3019_v53, %v1843_v5  ;;  %v1166_v17 = vmul.f32 %v3025_v22, %v3970_v37  ;;  %v1414_v30 = vand.u32 2147483647, %v3989_v40  ;;  %3032 = vrcp.f32 %v4009_v7 }
 0x104   : > { %vm1170_vm5 = vweird.f32 %v3970_v37  ;;  %vm4023_vm6 = vcmp.eq.f32.partialorder %v1174_v54, 8.507059e+37  ;;  %v1416_v19 = vand.u32 2147483648, %v3989_v40  ;;  %3034 = vrcp.f32 %v4014_v44 }
 0x105   : > { %v3027_v59 = vpop.eup %3026  ;;  %v1848_v11 = vsel %vm1847_vm4, %v3019_v53, %v1844_v16  ;;  %v1167_v31 = vsub.f32 1.0, %v1166_v17  ;;  %vm1171_vm7 = vweird.f32 %v3025_v22  ;;  %v1177_v9 = vor.u32 1.1754944e-38, %v1176_v41 }
 0x106   : > { %v3029_v34 = vpop.eup %3028  ;;  %v1853_v12 = vsel %vm3999_vm2, %v1852_v60, %v1848_v11  ;;  %v1406_v55 = vmul.f32 %v3027_v59, %v3989_v40  ;;  %vm1410_vm8 = vweird.f32 %v3989_v40  ;;  %v772_v63 = vadd.f32 %v3455_v35, %v771_v47  ;;  %vm4043_vm10 = vmor %vm1170_vm5, %vm1171_vm7 }
 0x107   : > { %v2178_v10 = vmul.f32 %v2114_v25, %v1853_v12  ;;  %v1168_v14 = vmul.f32 %v3025_v22, %v1167_v31  ;;  %vm4036_vm9 = vcmp.eq.f32.partialorder %v1414_v30, 8.507059e+37  ;;  %v817_v43 = vadd.f32 %v3455_v35, %v816_v24 }
 0x108   : > { %v3031_v53 = vpop.eup %3030  ;;  %v1407_v32 = vsub.f32 1.0, %v1406_v55  ;;  %vm1411_vm11 = vweird.f32 %v3027_v59  ;;  %v1417_v62 = vor.u32 1.1754944e-38, %v1416_v19  ;;  %v4047_v20 = vadd.f32 1.0, %v3029_v34 }
 0x109   : > { %v4049_v46 = vpop.eup %3032  ;;  %v2320_v25 = vsel %vm583_vm0, %v2178_v10, 0.0  ;;  %v1169_v38 = vadd.f32 %v3025_v22, %v1168_v14  ;;  %vm1590_vm12 = vweird.f32 %v4009_v7  ;;  %v1594_v35 = vand.u32 2147483647, %v4009_v7  ;;  %vm4065_vm13 = vmor %vm1410_vm8, %vm1411_vm11 }
 0x10a   : > { %v3035_v6 = vpop.eup %3034  ;;  %v4055_v37 = vadd.f32 %v2320_v25, %v3982_v48  ;;  %v1408_v58 = vmul.f32 %v3027_v59, %v1407_v32  ;;  %v1586_v60 = vmul.f32 %v4049_v46, %v4009_v7  ;;  %v4059_v61 = vadd.f32 1.0, %v3031_v53  ;;  %v4190_v25 = vld [vmem:[%s3390_s14 + $0x58] sm:$0xff]  }
 0x10b   : > { %v1173_v54 = vsel %vm4043_vm10, %v3025_v22, %v1169_v38  ;;  %v1596_v26 = vand.u32 2147483648, %v4009_v7  ;;  %v1856_v48 = vmul.f32 %v3035_v6, %v4014_v44  ;;  %v1864_v5 = vand.u32 2147483647, %v4014_v44 }
 0x10c   : > { %v1178_v41 = vsel %vm4023_vm6, %v1177_v9, %v1173_v54  ;;  %v1409_v16 = vadd.f32 %v3027_v59, %v1408_v58  ;;  %v1587_v17 = vsub.f32 1.0, %v1586_v60  ;;  %3036 = vrcp.f32 %v4047_v20 }
 0x10d   : > { %v2133_v40 = vmul.f32 %v2069_v49, %v1178_v41  ;;  %v1857_v22 = vsub.f32 1.0, %v1856_v48  ;;  %v1866_v30 = vand.u32 2147483648, %v4014_v44  ;;  %v2804_v47 = vmul.f32 -1.442695, %v772_v63  ;;  %v774_v48 = vpop.f32.mrf.mxu2 }
 0x10e   : > { %v1413_v19 = vsel %vm4065_vm13, %v3027_v59, %v1409_v16  ;;  %v1588_v24 = vmul.f32 %v4049_v46, %v1587_v17  ;;  %vm1591_vm14 = vweird.f32 %v4049_v46  ;;  %3038 = vrcp.f32 %v4059_v61 }
 0x10f   : > { %v2200_v13 = vsel %vm583_vm0, %v2133_v40, 0.0  ;;  %v1858_v11 = vmul.f32 %v3035_v6, %v1857_v22  ;;  %vm1860_vm15 = vweird.f32 %v4014_v44  ;;  %vm1861_vm1 = vweird.f32 %v3035_v6  ;;  %vm4098_vm3 = vmor %vm1590_vm12, %vm1591_vm14 }
 0x110   : > { %v4086_v49 = vadd.f32 %v2200_v13, %v3934_v8  ;;  %v1589_v31 = vadd.f32 %v4049_v46, %v1588_v24  ;;  %vm4089_vm2 = vcmp.eq.f32.partialorder %v1594_v35, 8.507059e+37  ;;  %v1189_v59 = vand.u32 2147483647, %v4047_v20  ;;  %vm1862_vm5 = vmor %vm1860_vm15, %vm1861_vm1 }
 0x111   : > { %v1418_v34 = vsel %vm4036_vm9, %v1417_v62, %v1413_v19  ;;  %v1597_v44 = vor.u32 1.1754944e-38, %v1596_v26  ;;  %v1859_v8 = vadd.f32 %v3035_v6, %v1858_v11  ;;  %vm1865_vm4 = vcmp.eq.f32.partialorder %v1864_v5, 8.507059e+37 }
 0x112   : > { %v3037_v55 = vpop.eup %3036  ;;  %v1867_v63 = vor.u32 1.1754944e-38, %v1866_v30  ;;  %vm1185_vm6 = vweird.f32 %v4047_v20  ;;  %3040 = vpow2.f32 %v2804_v47  ;;  %v2822_v10 = vmul.f32 -1.442695, %v817_v43  ;;  %v704_v43 = vpop.f32.mrf.mxu0 }
 0x113   : > { %v1593_v14 = vsel %vm4098_vm3, %v4049_v46, %v1589_v31  ;;  %v1863_v50 = vsel %vm1862_vm5, %v3035_v6, %v1859_v8  ;;  %v1181_v7 = vmul.f32 %v3037_v55, %v4047_v20  ;;  %v1191_v53 = vand.u32 2147483648, %v4047_v20  ;;  %v744_v6 = vpop.f32.mrf.mxu1 }
 0x114   : > { %v4108_v29 = vpop.eup %3038  ;;  %v2149_v32 = vmul.f32 %v2085_v51, %v1418_v34  ;;  %v1868_v62 = vsel %vm1865_vm4, %v1867_v63, %v1863_v50  ;;  %vm4112_vm7 = vcmp.eq.f32.partialorder %v1189_v59, 8.507059e+37  ;;  %vm1425_vm8 = vweird.f32 %v4059_v61 }
 0x115   : > { %v2179_v46 = vmul.f32 %v2115_v1, %v1868_v62  ;;  %v1182_v38 = vsub.f32 1.0, %v1181_v7  ;;  %vm1186_vm9 = vweird.f32 %v3037_v55  ;;  %v1421_v35 = vmul.f32 %v4108_v29, %v4059_v61  ;;  %v4129_v1 = vld [vmem:[%s5450_s2] ss:$0 sm:$0xff] }
 0x116   : > { %v1598_v51 = vsel %vm4089_vm2, %v1597_v44, %v1593_v14  ;;  %vm1426_vm10 = vweird.f32 %v4108_v29  ;;  %v1429_v58 = vand.u32 2147483647, %v4059_v61  ;;  %3042 = vpow2.f32 %v2822_v10  ;;  %vm4138_vm11 = vmor %vm1185_vm6, %vm1186_vm9 }
 0x117   : > { %v2322_v60 = vsel %vm583_vm0, %v2179_v46, 0.0  ;;  %v1183_v54 = vmul.f32 %v3037_v55, %v1182_v38  ;;  %v1422_v56 = vsub.f32 1.0, %v1421_v35  ;;  %v705_v26 = vadd.f32 %v4129_v1, %v704_v43  ;;  %vm4154_vm12 = vmor %vm1425_vm8, %vm1426_vm10 }
 0x118   : > { %v3041_v5 = vpop.eup %3040  ;;  %v4133_v41 = vadd.f32 %v2322_v60, %v4055_v37  ;;  %v1192_v17 = vor.u32 1.1754944e-38, %v1191_v53  ;;  %v1431_v40 = vand.u32 2147483648, %v4059_v61  ;;  %v745_v22 = vadd.f32 %v4129_v1, %v744_v6  ;;  %v819_v37 = vpop.f32.mrf.mxu3  ;;  %v4181_v53 = vld [vmem:[%s3390_s14 + $0x18] sm:$0xff]  }
 0x119   : > { %v1184_v30 = vadd.f32 %v3037_v55, %v1183_v54  ;;  %v1423_v47 = vmul.f32 %v4108_v29, %v1422_v56  ;;  %v4145_v19 = vadd.f32 1.0, %v3041_v5  ;;  %v2777_v24 = vmul.f32 -1.442695, %v705_v26  ;;  %v4211_v56 = vld [vmem:[%s3390_s14 + $0x88] sm:$0xff]  }
 0x11a   : > { %v2242_v13 = vsel %vm583_vm0, %v2149_v32, 0.0  ;;  %v2161_v20 = vmul.f32 %v2097_v3, %v1598_v51  ;;  %v2793_v31 = vmul.f32 -1.442695, %v745_v22  ;;  %v775_v9 = vadd.f32 %v4129_v1, %v774_v48  ;;  %v706_v62 = vpop.f32.mrf.mxu0 }
 0x11b   : > { %v1188_v59 = vsel %vm4138_vm11, %v3037_v55, %v1184_v30  ;;  %v1424_v34 = vadd.f32 %v4108_v29, %v1423_v47  ;;  %vm4162_vm13 = vcmp.eq.f32.partialorder %v1429_v58, 8.507059e+37  ;;  %3044 = vrcp.f32 %v4145_v19  ;;  %v4223_v47 = vld [vmem:[%s3390_s14 + $0xd0] sm:$0xff]  }
 0x11c   : > { %v3043_v3 = vpop.eup %3042  ;;  %v1193_v61 = vsel %vm4112_vm7, %v1192_v17, %v1188_v59  ;;  %v1432_v44 = vor.u32 1.1754944e-38, %v1431_v40  ;;  %3046 = vpow2.f32 %v2777_v24  ;;  %v820_v8 = vadd.f32 %v4129_v1, %v819_v37  ;;  %v746_v24 = vpop.f32.mrf.mxu1 }
 0x11d   : > { %v2134_v55 = vmul.f32 %v2070_v36, %v1193_v61  ;;  %v1428_v63 = vsel %vm4154_vm12, %v4108_v29, %v1424_v34  ;;  %v4175_v10 = vadd.f32 1.0, %v3043_v3  ;;  %3048 = vpow2.f32 %v2793_v31 }
 0x11e   : > { %v2086_v14 = vunpack.c.h.bf16 %v3960_v33  ;;  %v1609_v50 = vand.u32 2147483647, %v4145_v19  ;;  %v2098_v7 = vunpack.c.h.bf16 %v3973_v23  ;;  %v2805_v32 = vmul.f32 -1.442695, %v775_v9 }
 0x11f   : > { %v4184_v57 = vadd.f32 %v2242_v13, %v4012_v15  ;;  %v2202_v36 = vsel %vm583_vm0, %v2134_v55, 0.0  ;;  %v1611_v29 = vand.u32 2147483648, %v4145_v19  ;;  %3050 = vrcp.f32 %v4175_v10 }
 0x120   : > { %v4193_v33 = vsel %vm583_vm0, %v2161_v20, 0.0  ;;  %v4196_v43 = vadd.f32 %v2202_v36, %v4086_v49  ;;  %v1433_v46 = vsel %vm4162_vm13, %v1432_v44, %v1428_v63  ;;  %3052 = vpow2.f32 %v2805_v32 }
 0x121   : > { %v3045_v15 = vpop.eup %3044  ;;  %v2116_v38 = vunpack.c.h.bf16 %v3993_v52  ;;  %v2071_v35 = vunpack.c.l.bf16 %v4181_v53  ;;  %v2823_v6 = vmul.f32 -1.442695, %v820_v8  ;;  %v707_v51 = vadd.f32 %v4129_v1, %v706_v62 }
 0x122   : > { %v3047_v58 = vpop.eup %3046  ;;  %v1601_v60 = vmul.f32 %v3045_v15, %v4145_v19  ;;  %vm1605_vm14 = vweird.f32 %v4145_v19  ;;  %vm4205_vm15 = vcmp.eq.f32.partialorder %v1609_v50, 8.507059e+37  ;;  %v2087_v54 = vunpack.c.l.bf16 %v4190_v25 }
 0x123   : > { %v3049_v26 = vpop.eup %3048  ;;  %v4213_v48 = vmul.f32 %v2086_v14, %v1433_v46  ;;  %v1612_v5 = vor.u32 1.1754944e-38, %v1611_v29  ;;  %v1879_v16 = vand.u32 2147483647, %v4175_v10  ;;  %v4216_v17 = vadd.f32 1.0, %v3047_v58 }
 0x124   : > { %v1602_v40 = vsub.f32 1.0, %v1601_v60  ;;  %vm1875_vm1 = vweird.f32 %v4175_v10  ;;  %v1881_v22 = vand.u32 2147483648, %v4175_v10  ;;  %v4220_v30 = vadd.f32 1.0, %v3049_v26 }
 0x125   : > { %3054 = vpow2.f32 %v2823_v6  ;;  %v3051_v37 = vpop.eup %3050  ;;  %vm1606_vm2 = vweird.f32 %v3045_v15  ;;  %v2099_v13 = vunpack.c.l.bf16 %v4211_v56  ;;  %v2778_v20 = vmul.f32 -1.442695, %v707_v51 }
 0x126   : > { %3056 = vrcp.f32 %v4216_v17  ;;  %v3053_v11 = vpop.eup %3052  ;;  %v1603_v31 = vmul.f32 %v3045_v15, %v1602_v40  ;;  %v1871_v9 = vmul.f32 %v3051_v37, %v4175_v10  ;;  %v1204_v59 = vand.u32 2147483647, %v4216_v17  ;;  %vm1607_vm4 = vmor %vm1605_vm14, %vm1606_vm2 }
 0x127   : > { %3058 = vrcp.f32 %v4220_v30  ;;  %vm4230_vm3 = vcmp.eq.f32.partialorder %v1879_v16, 8.507059e+37  ;;  %v1206_v12 = vand.u32 2147483648, %v4216_v17  ;;  %v2117_v3 = vunpack.c.l.bf16 %v4223_v47 }
 0x128   : > { %v747_v61 = vadd.f32 %v4129_v1, %v746_v24  ;;  %v1604_v44 = vadd.f32 %v3045_v15, %v1603_v31  ;;  %v1872_v8 = vsub.f32 1.0, %v1871_v9  ;;  %v1882_v55 = vor.u32 1.1754944e-38, %v1881_v22 }
 0x129   : > { %v4237_v63 = vadd.f32 1.0, %v3053_v11  ;;  %vm1876_vm5 = vweird.f32 %v3051_v37  ;;  %vm1200_vm6 = vweird.f32 %v4216_v17  ;;  %3060 = vpow2.f32 %v2778_v20 }
 0x12a   : > { %v2072_v14 = vunpack.c.h.bf16 %v4181_v53  ;;  %v1608_v32 = vsel %vm1607_vm4, %v3045_v15, %v1604_v44  ;;  %v1873_v62 = vmul.f32 %v3051_v37, %v1872_v8  ;;  %vm4244_vm7 = vcmp.eq.f32.partialorder %v1204_v59, 8.507059e+37  ;;  %vm1877_vm9 = vmor %vm1875_vm1, %vm1876_vm5 }
 0x12b   : > { %v3055_v50 = vpop.eup %3054  ;;  %3062 = vrcp.f32 %v4237_v63  ;;  %v1613_v19 = vsel %vm4205_vm15, %v1612_v5, %v1608_v32  ;;  %v1207_v46 = vor.u32 1.1754944e-38, %v1206_v12  ;;  %vm1440_vm8 = vweird.f32 %v4220_v30 }
 0x12c   : > { %v3057_v29 = vpop.eup %3056  ;;  %v2794_v6 = vmul.f32 -1.442695, %v747_v61  ;;  %v2162_v58 = vmul.f32 %v2098_v7, %v1613_v19  ;;  %v1874_v15 = vadd.f32 %v3051_v37, %v1873_v62  ;;  %v1444_v26 = vand.u32 2147483647, %v4220_v30 }
 0x12d   : > { %v3059_v51 = vpop.eup %3058  ;;  %v1196_v60 = vmul.f32 %v3057_v29, %v4216_v17  ;;  %vm1201_vm10 = vweird.f32 %v3057_v29  ;;  %v1446_v5 = vand.u32 2147483648, %v4220_v30  ;;  %v4262_v7 = vadd.f32 1.0, %v3055_v50 }
 0x12e   : > { %v1436_v49 = vmul.f32 %v3059_v51, %v4220_v30  ;;  %vm1441_vm11 = vweird.f32 %v3059_v51  ;;  %v2278_v16 = vsel %vm583_vm0, %v2162_v58, 0.0  ;;  %v1878_v40 = vsel %vm1877_vm9, %v3051_v37, %v1874_v15  ;;  %vm4276_vm12 = vmor %vm1200_vm6, %vm1201_vm10  ;;  %v709_v30 = vpop.f32.mrf.mxu0 }
 0x12f   : > { %v1197_v23 = vsub.f32 1.0, %v1196_v60  ;;  %v3061_v22 = vpop.eup %3060  ;;  %v4265_v24 = vadd.f32 %v2278_v16, %v4193_v33  ;;  %v1883_v10 = vsel %vm4230_vm3, %v1882_v55, %v1878_v40  ;;  %3064 = vpow2.f32 %v2794_v6  ;;  %vm4289_vm14 = vmor %vm1440_vm8, %vm1441_vm11  ;;  %v776_v16 = vpop.f32.mrf.mxu2 }
 0x130   : > { %v1437_v20 = vsub.f32 1.0, %v1436_v49  ;;  %v2180_v31 = vmul.f32 %v2116_v38, %v1883_v10  ;;  %v1624_v59 = vand.u32 2147483647, %v4237_v63  ;;  %3066 = vrcp.f32 %v4262_v7 }
 0x131   : > { %v3063_v11 = vpop.eup %3062  ;;  %v1198_v9 = vmul.f32 %v3057_v29, %v1197_v23  ;;  %vm4280_vm13 = vcmp.eq.f32.partialorder %v1444_v26, 8.507059e+37  ;;  %v1447_v12 = vor.u32 1.1754944e-38, %v1446_v5  ;;  %v1626_v44 = vand.u32 2147483648, %v4237_v63 }
 0x132   : > { %v1438_v37 = vmul.f32 %v3059_v51, %v1437_v20  ;;  %v1616_v52 = vmul.f32 %v3063_v11, %v4237_v63  ;;  %v2324_v38 = vsel %vm583_vm0, %v2180_v31, 0.0  ;;  %v4294_v8 = vadd.f32 1.0, %v3061_v22 }
 0x133   : > { %v1199_v61 = vadd.f32 %v3057_v29, %v1198_v9  ;;  %v4297_v55 = vadd.f32 %v2324_v38, %v4133_v41  ;;  %vm1620_vm15 = vweird.f32 %v4237_v63  ;;  %vm1621_vm1 = vweird.f32 %v3063_v11  ;;  %v821_v9 = vpop.f32.mrf.mxu3 }
 0x134   : > { %v1439_v50 = vadd.f32 %v3059_v51, %v1438_v37  ;;  %v1617_v32 = vsub.f32 1.0, %v1616_v52  ;;  %vm4302_vm2 = vcmp.eq.f32.partialorder %v1624_v59, 8.507059e+37  ;;  %3068 = vrcp.f32 %v4294_v8  ;;  %vm1622_vm4 = vmor %vm1620_vm15, %vm1621_vm1 }
 0x135   : > { %v1203_v62 = vsel %vm4276_vm12, %v3057_v29, %v1199_v61  ;;  %v3065_v19 = vpop.eup %3064  ;;  %v1894_v15 = vand.u32 2147483647, %v4262_v7  ;;  %v1627_v26 = vor.u32 1.1754944e-38, %v1626_v44  ;;  %v1896_v49 = vand.u32 2147483648, %v4262_v7 }
 0x136   : > { %v1208_v6 = vsel %vm4244_vm7, %v1207_v46, %v1203_v62  ;;  %v1443_v41 = vsel %vm4289_vm14, %v3059_v51, %v1439_v50  ;;  %v1618_v58 = vmul.f32 %v3063_v11, %v1617_v32  ;;  %v3067_v60 = vpop.eup %3066  ;;  %v4315_v5 = vadd.f32 1.0, %v3065_v19 }
 0x137   : > { %v2135_v29 = vmul.f32 %v2071_v35, %v1208_v6  ;;  %v1448_v36 = vsel %vm4280_vm13, %v1447_v12, %v1443_v41  ;;  %v1886_v40 = vmul.f32 %v3067_v60, %v4262_v7  ;;  %vm1890_vm3 = vweird.f32 %v4262_v7 }
 0x138   : > { %v1619_v46 = vadd.f32 %v3063_v11, %v1618_v58  ;;  %v1219_v35 = vand.u32 2147483647, %v4294_v8  ;;  %v1221_v23 = vand.u32 2147483648, %v4294_v8  ;;  %3070 = vrcp.f32 %v4315_v5 }
 0x139   : > { %v2204_v51 = vsel %vm583_vm0, %v2135_v29, 0.0  ;;  %v1887_v20 = vsub.f32 1.0, %v1886_v40  ;;  %vm4331_vm5 = vcmp.eq.f32.partialorder %v1894_v15, 8.507059e+37  ;;  %v4337_v63 = vmul.f32 %v2087_v54, %v1448_v36  ;;  %v749_v36 = vpop.f32.mrf.mxu1 }
 0x13a   : > { %v4329_v22 = vadd.f32 %v2204_v51, %v4196_v43  ;;  %v1623_v10 = vsel %vm1622_vm4, %v3063_v11, %v1619_v46  ;;  %v3069_v59 = vpop.eup %3068  ;;  %v1897_v37 = vor.u32 1.1754944e-38, %v1896_v49  ;;  %vm1215_vm6 = vweird.f32 %v4294_v8 }
 0x13b   : > { %v1628_v33 = vsel %vm4302_vm2, %v1627_v26, %v1623_v10  ;;  %v1888_v11 = vmul.f32 %v3067_v60, %v1887_v20  ;;  %vm1891_vm7 = vweird.f32 %v3067_v60  ;;  %v1211_v34 = vmul.f32 %v3069_v59, %v4294_v8  ;;  %v824_v20 = vpop.f32.mrf.mxu3 }
 0x13c   : > { %v2163_v43 = vmul.f32 %v2099_v13, %v1628_v33  ;;  %vm1216_vm8 = vweird.f32 %v3069_v59  ;;  %vm4345_vm9 = vcmp.eq.f32.partialorder %v1219_v35, 8.507059e+37  ;;  %v1222_v54 = vor.u32 1.1754944e-38, %v1221_v23  ;;  %vm1892_vm10 = vmor %vm1890_vm3, %vm1891_vm7 }
 0x13d   : > { %v777_v52 = vadd.f32 %v4129_v1, %v776_v16  ;;  %v1889_v61 = vadd.f32 %v3067_v60, %v1888_v11  ;;  %v1212_v17 = vsub.f32 1.0, %v1211_v34  ;;  %v822_v44 = vadd.f32 %v4129_v1, %v821_v9  ;;  %vm4366_vm12 = vmor %vm1215_vm6, %vm1216_vm8 }
 0x13e   : > { %v2280_v38 = vsel %vm583_vm0, %v2163_v43, 0.0  ;;  %v3071_v50 = vpop.eup %3070  ;;  %vm1455_vm11 = vweird.f32 %v4315_v5  ;;  %v1461_v32 = vand.u32 2147483648, %v4315_v5  ;;  %v1459_v58 = vand.u32 2147483647, %v4315_v5 }
 0x13f   : > { %v4353_v13 = vadd.f32 %v2280_v38, %v4265_v24  ;;  %v2806_v62 = vmul.f32 -1.442695, %v777_v52  ;;  %v1893_v19 = vsel %vm1892_vm10, %v3067_v60, %v1889_v61  ;;  %v1213_v6 = vmul.f32 %v3069_v59, %v1212_v17  ;;  %v779_v60 = vpop.f32.mrf.mxu2 }
 0x140   : > { %v1451_v41 = vmul.f32 %v3071_v50, %v4315_v5  ;;  %v1898_v15 = vsel %vm4331_vm5, %v1897_v37, %v1893_v19  ;;  %v2824_v24 = vmul.f32 -1.442695, %v822_v44  ;;  %v710_v29 = vadd.f32 %v4129_v1, %v709_v30 }
 0x141   : > { %3072 = vpow2.f32 %v2806_v62  ;;  %v2181_v26 = vmul.f32 %v2117_v3, %v1898_v15  ;;  %v1214_v49 = vadd.f32 %v3069_v59, %v1213_v6  ;;  %vm1456_vm13 = vweird.f32 %v3071_v50 }
 0x142   : > { %v1452_v16 = vsub.f32 1.0, %v1451_v41  ;;  %v1462_v46 = vor.u32 1.1754944e-38, %v1461_v32  ;;  %3074 = vpow2.f32 %v2824_v24  ;;  %v2779_v40 = vmul.f32 -1.442695, %v710_v29  ;;  %vm4385_vm14 = vmor %vm1455_vm11, %vm1456_vm13 }
 0x143   : > { %v750_v8 = vadd.f32 %v4129_v1, %v749_v36  ;;  %v2326_v51 = vsel %vm583_vm0, %v2181_v26, 0.0  ;;  %v1218_v35 = vsel %vm4366_vm12, %v3069_v59, %v1214_v49  ;;  %v780_v10 = vadd.f32 %v4129_v1, %v779_v60  ;;  %v4444_v26 = vld [vmem:[%s3390_s14 + $0xd8] sm:$0xff]   ;;  %v751_v49 = vpop.f32.mrf.mxu1 }
 0x144   : > { %v1453_v23 = vmul.f32 %v3071_v50, %v1452_v16  ;;  %v4379_v3 = vadd.f32 %v2326_v51, %v4297_v55  ;;  %v1223_v31 = vsel %vm4345_vm9, %v1222_v54, %v1218_v35  ;;  %3076 = vpow2.f32 %v2779_v40 }
 0x145   : > { %v2795_v33 = vmul.f32 -1.442695, %v750_v8  ;;  %v2136_v59 = vmul.f32 %v2072_v14, %v1223_v31  ;;  %vm1460_vm15 = vcmp.eq.f32.partialorder %v1459_v58, 8.507059e+37  ;;  %v2088_v43 = vunpack.c.h.bf16 %v4190_v25 }
 0x146   : > { %v1454_v37 = vadd.f32 %v3071_v50, %v1453_v23  ;;  %v2244_v11 = vsel %vm583_vm0, %v4213_v48, 0.0  ;;  %v2807_v34 = vmul.f32 -1.442695, %v780_v10  ;;  %v825_v5 = vadd.f32 %v4129_v1, %v824_v20 }
 0x147   : > { %v3073_v55 = vpop.eup %3072  ;;  %3078 = vpow2.f32 %v2795_v33  ;;  %v4398_v12 = vmul.f32 %v2112_v21, %v3810_v42  ;;  %v2206_v53 = vsel %vm583_vm0, %v2136_v59, 0.0  ;;  %v4407_v48 = vsel %vm583_vm0, %v3949_v39, 0.0  ;;  %v711_v42 = vpop.f32.mrf.mxu0 }
 0x148   : > { %v1458_v14 = vsel %vm4385_vm14, %v3071_v50, %v1454_v37  ;;  %v4403_v25 = vadd.f32 1.0, %v3073_v55  ;;  %v3075_v54 = vpop.eup %3074  ;;  %v2246_v52 = vsel %vm583_vm0, %v4337_v63, 0.0  ;;  %v2207_v4 = vadd.f32 %v2206_v53, %v4329_v22  ;;  %v4422_v63 = vld [vmem:[%s3390_s14 + $0x20] sm:$0xff]  }
 0x149   : > { %v1463_v21 = vsel %vm1460_vm15, %v1462_v46, %v1458_v14  ;;  %v4415_v38 = vmul.f32 %v2096_v18, %v3997_v0  ;;  %v2245_v61 = vadd.f32 %v2244_v11, %v4184_v57  ;;  %v4419_v50 = vadd.f32 1.0, %v3075_v54  ;;  %v4431_v18 = vld [vmem:[%s3390_s14 + $0x90] sm:$0xff]  }
 0x14a   : > { %v2152_v17 = vmul.f32 %v2088_v43, %v1463_v21  ;;  %3080 = vrcp.f32 %v4403_v25  ;;  %v3077_v39 = vpop.eup %3076  ;;  %v2208_v44 = vrot.slane %v2207_v4, 4  ;;  %v2825_v22 = vmul.f32 -1.442695, %v825_v5 }
 0x14b   : > { %3082 = vpow2.f32 %v2807_v34  ;;  %v2247_v32 = vadd.f32 %v2246_v52, %v2245_v61  ;;  %v4425_v30 = vadd.f32 1.0, %v3077_v39  ;;  %v712_v0 = vadd.f32 %v4129_v1, %v711_v42 }
 0x14c   : > { %v2248_v62 = vsel %vm583_vm0, %v2152_v17, 0.0  ;;  %v1639_v19 = vand.u32 2147483647, %v4403_v25  ;;  %v2100_v6 = vunpack.c.h.bf16 %v4211_v56  ;;  %3084 = vrcp.f32 %v4419_v50 }
 0x14d   : > { %v3079_v57 = vpop.eup %3078  ;;  %v2118_v41 = vunpack.c.h.bf16 %v4223_v47  ;;  %v2209_v58 = vadd.f32 %v2208_v44, %v2207_v4  ;;  %v1641_v15 = vand.u32 2147483648, %v4403_v25  ;;  %3086 = vrcp.f32 %v4425_v30 }
 0x14e   : > { %v2073_v7 = vunpack.c.l.bf16 %v4422_v63  ;;  %v2249_v24 = vadd.f32 %v2248_v62, %v2247_v32  ;;  %v2089_v29 = vunpack.c.l.bf16 %v4428_v45  ;;  %v2101_v60 = vunpack.c.l.bf16 %v4431_v18 }
 0x14f   : > { %3088 = vpow2.f32 %v2825_v22  ;;  %v1909_v36 = vand.u32 2147483647, %v4419_v50  ;;  %v4447_v46 = vadd.f32 1.0, %v3079_v57  ;;  %v2780_v40 = vmul.f32 -1.442695, %v712_v0 }
 0x150   : > { %v3081_v16 = vpop.eup %3080  ;;  %v4450_v8 = vadd.f32 %v4129_v1, %v751_v49  ;;  %vm1635_vm1 = vweird.f32 %v4403_v25  ;;  %vm4454_vm2 = vcmp.eq.f32.partialorder %v1639_v19, 8.507059e+37  ;;  %v1911_v10 = vand.u32 2147483648, %v4419_v50 }
 0x151   : > { %v3083_v51 = vpop.eup %3082  ;;  %v1631_v35 = vmul.f32 %v3081_v16, %v4403_v25  ;;  %v2210_v20 = vrot.slane %v2209_v58, 2  ;;  %v1642_v31 = vor.u32 1.1754944e-38, %v1641_v15  ;;  %3090 = vrcp.f32 %v4447_v46 }
 0x152   : > { %v2119_v9 = vunpack.c.l.bf16 %v4444_v26  ;;  %v3085_v33 = vpop.eup %3084  ;;  %v2250_v59 = vrot.slane %v2249_v24, 4  ;;  %vm1905_vm3 = vweird.f32 %v4419_v50  ;;  %vm1230_vm4 = vweird.f32 %v4425_v30 }
 0x153   : > { %v1632_v37 = vsub.f32 1.0, %v1631_v35  ;;  %v4463_v43 = vpop.eup %3086  ;;  %v1901_v55 = vmul.f32 %v3085_v33, %v4419_v50  ;;  %vm4466_vm5 = vcmp.eq.f32.partialorder %v1909_v36, 8.507059e+37  ;;  %v1234_v34 = vand.u32 2147483647, %v4425_v30 }
 0x154   : > { %v4471_v5 = vadd.f32 1.0, %v3083_v51  ;;  %vm1636_vm6 = vweird.f32 %v3081_v16  ;;  %v1912_v54 = vor.u32 1.1754944e-38, %v1911_v10  ;;  %v1226_v52 = vmul.f32 %v4463_v43, %v4425_v30 }
 0x155   : > { %v3089_v53 = vpop.eup %3088  ;;  %v1633_v14 = vmul.f32 %v3081_v16, %v1632_v37  ;;  %v4475_v4 = vadd.f32 %v2210_v20, %v2209_v58  ;;  %v1902_v21 = vsub.f32 1.0, %v1901_v55  ;;  %v1236_v42 = vand.u32 2147483648, %v4425_v30  ;;  %vm1637_vm7 = vmor %vm1635_vm1, %vm1636_vm6 }
 0x156   : > { %3092 = vrcp.f32 %v4471_v5  ;;  %v4479_v61 = vadd.f32 %v2250_v59, %v2249_v24  ;;  %v1227_v39 = vsub.f32 1.0, %v1226_v52  ;;  %v1474_v44 = vand.u32 2147483647, %v4447_v46 }
 0x157   : > { %v1634_v17 = vadd.f32 %v3081_v16, %v1633_v14  ;;  %v4482_v22 = vpop.eup %3090  ;;  %v1903_v32 = vmul.f32 %v3085_v33, %v1902_v21  ;;  %vm1906_vm8 = vweird.f32 %v3085_v33  ;;  %v4486_v62 = vadd.f32 1.0, %v3089_v53 }
 0x158   : > { %3094 = vpow2.f32 %v2780_v40  ;;  %v1228_v57 = vmul.f32 %v4463_v43, %v1227_v39  ;;  %vm1231_vm9 = vweird.f32 %v4463_v43  ;;  %v1466_v19 = vmul.f32 %v4482_v22, %v4447_v46  ;;  %vm1907_vm11 = vmor %vm1905_vm3, %vm1906_vm8 }
 0x159   : > { %v1638_v0 = vsel %vm1637_vm7, %v3081_v16, %v1634_v17  ;;  %v1904_v15 = vadd.f32 %v3085_v33, %v1903_v32  ;;  %vm4494_vm10 = vcmp.eq.f32.partialorder %v1234_v34, 8.507059e+37  ;;  %v1476_v24 = vand.u32 2147483648, %v4447_v46  ;;  %vm4508_vm12 = vmor %vm1230_vm4, %vm1231_vm9 }
 0x15a   : > { %v1643_v58 = vsel %vm4454_vm2, %v1642_v31, %v1638_v0  ;;  %v1229_v16 = vadd.f32 %v4463_v43, %v1228_v57  ;;  %v1467_v36 = vsub.f32 1.0, %v1466_v19  ;;  %3096 = vrcp.f32 %v4486_v62 }
 0x15b   : > { %v2164_v49 = vmul.f32 %v2100_v6, %v1643_v58  ;;  %v2252_v51 = vrot.slane %v4479_v61, 2  ;;  %v1908_v35 = vsel %vm1907_vm11, %v3085_v33, %v1904_v15  ;;  %v1237_v56 = vor.u32 1.1754944e-38, %v1236_v42  ;;  %v826_v58 = vpop.f32.mrf.mxu3 }
 0x15c   : > { %v3093_v40 = vpop.eup %3092  ;;  %vm1470_vm13 = vweird.f32 %v4447_v46  ;;  %v1913_v6 = vsel %vm4466_vm5, %v1912_v54, %v1908_v35  ;;  %v1468_v10 = vmul.f32 %v4482_v22, %v1467_v36  ;;  %vm4517_vm14 = vcmp.eq.f32.partialorder %v1474_v44, 8.507059e+37 }
 0x15d   : > { %v2282_v50 = vsel %vm583_vm0, %v2164_v49, 0.0  ;;  %v2182_v33 = vmul.f32 %v2118_v41, %v1913_v6  ;;  %vm1471_vm15 = vweird.f32 %v4482_v22  ;;  %v1646_v59 = vmul.f32 %v3093_v40, %v4471_v5  ;;  %v781_v41 = vpop.f32.mrf.mxu2 }
 0x15e   : > { %v3095_v31 = vpop.eup %3094  ;;  %v2283_v30 = vadd.f32 %v2282_v50, %v4353_v13  ;;  %v1233_v37 = vsel %vm4508_vm12, %v4463_v43, %v1229_v16  ;;  %v1477_v55 = vor.u32 1.1754944e-38, %v1476_v24  ;;  %v1654_v11 = vand.u32 2147483647, %v4471_v5  ;;  %vm4540_vm1 = vmor %vm1470_vm13, %vm1471_vm15  ;;  %v714_v16 = vpop.f32.mrf.mxu0 }
 0x15f   : > { %v1656_v34 = vand.u32 2147483648, %v4471_v5  ;;  %v2328_v53 = vsel %vm583_vm0, %v2182_v33, 0.0  ;;  %v1469_v13 = vadd.f32 %v4482_v22, %v1468_v10  ;;  %v1647_v14 = vsub.f32 1.0, %v1646_v59  ;;  %v754_v50 = vpop.f32.mrf.mxu1 }
 0x160   : > { %v4533_v47 = vadd.f32 1.0, %v3095_v31  ;;  %v3097_v54 = vpop.eup %3096  ;;  %v4536_v52 = vadd.f32 %v2328_v53, %v4379_v3  ;;  %vm1650_vm2 = vweird.f32 %v4471_v5  ;;  %v1924_v21 = vand.u32 2147483647, %v4486_v62 }
 0x161   : > { %v1926_v42 = vand.u32 2147483648, %v4486_v62  ;;  %v1238_v17 = vsel %vm4494_vm10, %v1237_v56, %v1233_v37  ;;  %v1648_v39 = vmul.f32 %v3093_v40, %v1647_v14  ;;  %vm1651_vm3 = vweird.f32 %v3093_v40 }
 0x162   : > { %v1916_v3 = vmul.f32 %v3097_v54, %v4486_v62  ;;  %vm4550_vm4 = vcmp.eq.f32.partialorder %v1654_v11, 8.507059e+37  ;;  %v1657_v46 = vor.u32 1.1754944e-38, %v1656_v34  ;;  %vm1920_vm5 = vweird.f32 %v4486_v62  ;;  %vm1652_vm6 = vmor %vm1650_vm2, %vm1651_vm3 }
 0x163   : > { %3098 = vrcp.f32 %v4533_v47  ;;  %v1473_v32 = vsel %vm4540_vm1, %v4482_v22, %v1469_v13  ;;  %v1649_v0 = vadd.f32 %v3093_v40, %v1648_v39  ;;  %v2796_v19 = vmul.f32 -1.442695, %v4450_v8 }
 0x164   : > { %v1917_v57 = vsub.f32 1.0, %v1916_v3  ;;  %v2137_v15 = vmul.f32 %v2073_v7, %v1238_v17  ;;  %vm4564_vm7 = vcmp.eq.f32.partialorder %v1924_v21, 8.507059e+37  ;;  %v1927_v24 = vor.u32 1.1754944e-38, %v1926_v42 }
 0x165   : > { %v782_v49 = vadd.f32 %v4129_v1, %v781_v41  ;;  %v1653_v22 = vsel %vm1652_vm6, %v3093_v40, %v1649_v0  ;;  %vm1921_vm8 = vweird.f32 %v3097_v54  ;;  %3100 = vpow2.f32 %v2796_v19 }
 0x166   : > { %v1918_v36 = vmul.f32 %v3097_v54, %v1917_v57  ;;  %v1478_v8 = vsel %vm4517_vm14, %v1477_v55, %v1473_v32  ;;  %v1658_v7 = vsel %vm4550_vm4, %v1657_v46, %v1653_v22  ;;  %v827_v35 = vadd.f32 %v4129_v1, %v826_v58  ;;  %vm1922_vm10 = vmor %vm1920_vm5, %vm1921_vm8  ;;  %v784_v55 = vpop.f32.mrf.mxu2  ;;  %v829_v46 = vpop.f32.mrf.mxu3  ;;  %v4633_v22 = vld [vmem:[%s3390_s14 + $0x28] sm:$0xff]  }
 0x167   : > { %v2808_v5 = vmul.f32 -1.442695, %v782_v49  ;;  %v2165_v23 = vmul.f32 %v2101_v60, %v1658_v7  ;;  %vm1245_vm9 = vweird.f32 %v4533_v47  ;;  %v715_v40 = vadd.f32 %v4129_v1, %v714_v16 }
 0x168   : > { %v1919_v56 = vadd.f32 %v3097_v54, %v1918_v36  ;;  %v1249_v10 = vand.u32 2147483647, %v4533_v47  ;;  %v2826_v20 = vmul.f32 -1.442695, %v827_v35  ;;  %v755_v31 = vadd.f32 %v4129_v1, %v754_v50  ;;  %v4636_v36 = vld [vmem:[%s3390_s14 + $0x68] sm:$0xff]  }
 0x169   : > { %v3099_v6 = vpop.eup %3098  ;;  %3102 = vpow2.f32 %v2808_v5  ;;  %v2284_v33 = vsel %vm583_vm0, %v2165_v23, 0.0  ;;  %v1251_v37 = vand.u32 2147483648, %v4533_v47  ;;  %v2781_v34 = vmul.f32 -1.442695, %v715_v40 }
 0x16a   : > { %v1923_v59 = vsel %vm1922_vm10, %v3097_v54, %v1919_v56  ;;  %v1241_v60 = vmul.f32 %v3099_v6, %v4533_v47  ;;  %v4585_v11 = vadd.f32 %v2284_v33, %v2283_v30  ;;  %3104 = vpow2.f32 %v2826_v20 }
 0x16b   : > { %v1928_v62 = vsel %vm4564_vm7, %v1927_v24, %v1923_v59  ;;  %v3101_v53 = vpop.eup %3100  ;;  %vm1246_vm11 = vweird.f32 %v3099_v6  ;;  %v2797_v41 = vmul.f32 -1.442695, %v755_v31  ;;  %v2153_v54 = vmul.f32 %v2089_v29, %v1478_v8  ;;  %v716_v24 = vpop.f32.mrf.mxu0 }
 0x16c   : > { %v2183_v13 = vmul.f32 %v2119_v9, %v1928_v62  ;;  %v1242_v14 = vsub.f32 1.0, %v1241_v60  ;;  %v4593_v43 = vadd.f32 1.0, %v3101_v53  ;;  %3106 = vpow2.f32 %v2781_v34  ;;  %vm4607_vm12 = vmor %vm1245_vm9, %vm1246_vm11 }
 0x16d   : > { %v785_v30 = vadd.f32 %v4129_v1, %v784_v55  ;;  %v4598_v21 = vsel %vm583_vm0, %v4415_v38, 0.0  ;;  %v2212_v42 = vrot.slane %v4475_v4, 1  ;;  %vm4611_vm13 = vcmp.eq.f32.partialorder %v1249_v10, 8.507059e+37  ;;  %v4654_v10 = vld [vmem:[%s3390_s14 + $0x98] sm:$0xff]   ;;  %v4666_v55 = vld [vmem:[%s3390_s14 + $0xe0] sm:$0xff]  }
 0x16e   : > { %v2330_v17 = vsel %vm583_vm0, %v2183_v13, 0.0  ;;  %v1243_v9 = vmul.f32 %v3099_v6, %v1242_v14  ;;  %v1252_v38 = vor.u32 1.1754944e-38, %v1251_v37  ;;  %3108 = vrcp.f32 %v4593_v43 }
 0x16f   : > { %v3103_v39 = vpop.eup %3102  ;;  %v4603_v3 = vadd.f32 %v2330_v17, %v4536_v52  ;;  %3110 = vpow2.f32 %v2797_v41  ;;  %v2809_v52 = vmul.f32 -1.442695, %v785_v30  ;;  %v4621_v57 = vadd.f32 %v2252_v51, %v4479_v61 }
 0x170   : > { %v1244_v32 = vadd.f32 %v3099_v6, %v1243_v9  ;;  %v4616_v0 = vadd.f32 1.0, %v3103_v39  ;;  %v3105_v47 = vpop.eup %3104  ;;  %v2214_v19 = vsel %vm583_vm0, %v2137_v15, 0.0  ;;  %v4625_v58 = vsel %vm583_vm0, %v2153_v54, 0.0 }
 0x171   : > { %v2074_v25 = vunpack.c.h.bf16 %v4422_v63  ;;  %v2090_v16 = vunpack.c.h.bf16 %v4428_v45  ;;  %v830_v61 = vadd.f32 %v4129_v1, %v829_v46  ;;  %v1489_v63 = vand.u32 2147483647, %v4593_v43 }
 0x172   : > { %v1248_v49 = vsel %vm4607_vm12, %v3099_v6, %v1244_v32  ;;  %3112 = vrcp.f32 %v4616_v0  ;;  %v3107_v51 = vpop.eup %3106  ;;  %v2102_v8 = vunpack.c.h.bf16 %v4431_v18  ;;  %v4643_v7 = vadd.f32 1.0, %v3105_v47 }
 0x173   : > { %v1253_v15 = vsel %vm4611_vm13, %v1252_v38, %v1248_v49  ;;  %v2120_v5 = vunpack.c.h.bf16 %v4444_v26  ;;  %v4646_v35 = vadd.f32 1.0, %v3107_v51  ;;  %3114 = vpow2.f32 %v2809_v52 }
 0x174   : > { %v717_v23 = vadd.f32 %v4129_v1, %v716_v24  ;;  %v3109_v56 = vpop.eup %3108  ;;  %v1491_v40 = vand.u32 2147483648, %v4593_v43  ;;  %3116 = vrcp.f32 %v4643_v7  ;;  %v2075_v50 = vunpack.c.l.bf16 %v4633_v22 }
 0x175   : > { %v2091_v6 = vunpack.c.l.bf16 %v4636_v36  ;;  %v3111_v20 = vpop.eup %3110  ;;  %v2138_v31 = vmul.f32 %v2074_v25, %v1253_v15  ;;  %v1481_v33 = vmul.f32 %v3109_v56, %v4593_v43  ;;  %vm1485_vm14 = vweird.f32 %v4593_v43 }
 0x176   : > { %v2827_v59 = vmul.f32 -1.442695, %v830_v61  ;;  %vm4658_vm15 = vcmp.eq.f32.partialorder %v1489_v63, 8.507059e+37  ;;  %v1669_v60 = vand.u32 2147483647, %v4616_v0  ;;  %v1671_v37 = vand.u32 2147483648, %v4616_v0 }
 0x177   : > { %3118 = vrcp.f32 %v4646_v35  ;;  %v1482_v34 = vsub.f32 1.0, %v1481_v33  ;;  %vm1486_vm1 = vweird.f32 %v3109_v56  ;;  %v2103_v53 = vunpack.c.l.bf16 %v4654_v10 }
 0x178   : > { %v3113_v62 = vpop.eup %3112  ;;  %v2782_v13 = vmul.f32 -1.442695, %v717_v23  ;;  %v1492_v14 = vor.u32 1.1754944e-38, %v1491_v40  ;;  %vm1665_vm2 = vweird.f32 %v4616_v0  ;;  %v4671_v54 = vadd.f32 1.0, %v3111_v20  ;;  %vm4679_vm3 = vmor %vm1485_vm14, %vm1486_vm1 }
 0x179   : > { %v1661_v41 = vmul.f32 %v3113_v62, %v4616_v0  ;;  %v3115_v30 = vpop.eup %3114  ;;  %v2215_v17 = vsel %vm583_vm0, %v2138_v31, 0.0  ;;  %v1483_v9 = vmul.f32 %v3109_v56, %v1482_v34  ;;  %3120 = vpow2.f32 %v2827_v59 }
 0x17a   : > { %v2121_v39 = vunpack.c.l.bf16 %v4666_v55  ;;  %v4675_v29 = vpop.eup %3116  ;;  %vm4683_vm4 = vcmp.eq.f32.partialorder %v1669_v60, 8.507059e+37  ;;  %v1672_v32 = vor.u32 1.1754944e-38, %v1671_v37  ;;  %3122 = vrcp.f32 %v4671_v54 }
 0x17b   : > { %v1662_v38 = vsub.f32 1.0, %v1661_v41  ;;  %v1484_v52 = vadd.f32 %v3109_v56, %v1483_v9  ;;  %v1931_v47 = vmul.f32 %v4675_v29, %v4643_v7  ;;  %vm1935_vm5 = vweird.f32 %v4643_v7  ;;  %v719_v9 = vpop.f32.mrf.mxu0 }
 0x17c   : > { %v1939_v43 = vand.u32 2147483647, %v4643_v7  ;;  %v4694_v24 = vadd.f32 %v2215_v17, %v2214_v19  ;;  %vm1666_vm6 = vweird.f32 %v3113_v62  ;;  %v4696_v61 = vadd.f32 1.0, %v3115_v30 }
 0x17d   : > { %v4692_v25 = vpop.eup %3118  ;;  %v1663_v49 = vmul.f32 %v3113_v62, %v1662_v38  ;;  %v1488_v51 = vsel %vm4679_vm3, %v3109_v56, %v1484_v52  ;;  %v1932_v15 = vsub.f32 1.0, %v1931_v47  ;;  %v1941_v63 = vand.u32 2147483648, %v4643_v7  ;;  %vm1667_vm8 = vmor %vm1665_vm2, %vm1666_vm6 }
 0x17e   : > { %v1256_v23 = vmul.f32 %v4692_v25, %v4646_v35  ;;  %vm1260_vm7 = vweird.f32 %v4646_v35  ;;  %v1264_v20 = vand.u32 2147483647, %v4646_v35  ;;  %3124 = vrcp.f32 %v4696_v61 }
 0x17f   : > { %v1664_v40 = vadd.f32 %v3113_v62, %v1663_v49  ;;  %v3121_v19 = vpop.eup %3120  ;;  %v1493_v31 = vsel %vm4658_vm15, %v1492_v14, %v1488_v51  ;;  %v1933_v56 = vmul.f32 %v4675_v29, %v1932_v15  ;;  %3126 = vpow2.f32 %v2782_v13  ;;  %v786_v15 = vpop.f32.mrf.mxu2 }
 0x180   : > { %v1257_v33 = vsub.f32 1.0, %v1256_v23  ;;  %v4711_v59 = vpop.eup %3122  ;;  %vm1936_vm9 = vweird.f32 %v4675_v29  ;;  %v1266_v37 = vand.u32 2147483648, %v4646_v35  ;;  %v4715_v34 = vadd.f32 1.0, %v3121_v19  ;;  %v756_v35 = vpop.f32.mrf.mxu1 }
 0x181   : > { %v1668_v60 = vsel %vm1667_vm8, %v3113_v62, %v1664_v40  ;;  %v1934_v41 = vadd.f32 %v4675_v29, %v1933_v56  ;;  %v1504_v0 = vand.u32 2147483647, %v4671_v54  ;;  %v1506_v14 = vand.u32 2147483648, %v4671_v54  ;;  %vm4730_vm11 = vmor %vm1935_vm5, %vm1936_vm9  ;;  %v831_v19 = vpop.f32.mrf.mxu3 }
 0x182   : > { %v1258_v1 = vmul.f32 %v4692_v25, %v1257_v33  ;;  %v2154_v13 = vmul.f32 %v2090_v16, %v1493_v31  ;;  %v1673_v62 = vsel %vm4683_vm4, %v1672_v32, %v1668_v60  ;;  %vm1261_vm10 = vweird.f32 %v4692_v25 }
 0x183   : > { %v1496_v30 = vmul.f32 %v4711_v59, %v4671_v54  ;;  %vm4734_vm12 = vcmp.eq.f32.partialorder %v1939_v43, 8.507059e+37  ;;  %v1942_v45 = vor.u32 1.1754944e-38, %v1941_v63  ;;  %vm1500_vm13 = vweird.f32 %v4671_v54  ;;  %vm4751_vm15 = vmor %vm1260_vm7, %vm1261_vm10 }
 0x184   : > { %vm1501_vm14 = vweird.f32 %v4711_v59  ;;  %v4740_v16 = vpop.eup %3124  ;;  %v1938_v44 = vsel %vm4730_vm11, %v4675_v29, %v1934_v41  ;;  %v1259_v7 = vadd.f32 %v4692_v25, %v1258_v1  ;;  %3128 = vrcp.f32 %v4715_v34  ;;  %v4794_v1 = vld [vmem:[%s5450_s2] ss:$0 sm:$0xff] }
 0x185   : > { %v1497_v38 = vsub.f32 1.0, %v1496_v30  ;;  %v3127_v46 = vpop.eup %3126  ;;  %v2166_v32 = vmul.f32 %v2102_v8, %v1673_v62  ;;  %vm4755_vm1 = vcmp.eq.f32.partialorder %v1264_v20, 8.507059e+37  ;;  %v1267_v29 = vor.u32 1.1754944e-38, %v1266_v37  ;;  %vm4773_vm3 = vmor %vm1500_vm13, %vm1501_vm14 }
 0x186   : > { %v1676_v43 = vmul.f32 %v4740_v16, %v4696_v61  ;;  %v2257_v49 = vsel %vm583_vm0, %v2154_v13, 0.0  ;;  %vm4763_vm2 = vcmp.eq.f32.partialorder %v1504_v0, 8.507059e+37  ;;  %v1507_v8 = vor.u32 1.1754944e-38, %v1506_v14 }
 0x187   : > { %v1498_v51 = vmul.f32 %v4711_v59, %v1497_v38  ;;  %v1943_v63 = vsel %vm4734_vm12, %v1942_v45, %v1938_v44  ;;  %vm1680_vm4 = vweird.f32 %v4696_v61  ;;  %v1684_v20 = vand.u32 2147483647, %v4696_v61 }
 0x188   : > { %v1677_v40 = vsub.f32 1.0, %v1676_v43  ;;  %v1263_v31 = vsel %vm4751_vm15, %v4692_v25, %v1259_v7  ;;  %v1686_v33 = vand.u32 2147483648, %v4696_v61  ;;  %v4784_v60 = vadd.f32 1.0, %v3127_v46 }
 0x189   : > { %v1499_v56 = vadd.f32 %v4711_v59, %v1498_v51  ;;  %v4787_v54 = vadd.f32 %v2257_v49, %v4625_v58  ;;  %v2286_v37 = vsel %vm583_vm0, %v2166_v32, 0.0  ;;  %v757_v25 = vadd.f32 %v4794_v1, %v756_v35  ;;  %v834_v23 = vpop.f32.mrf.mxu3 }
 0x18a   : > { %v1678_v41 = vmul.f32 %v4740_v16, %v1677_v40  ;;  %v3129_v0 = vpop.eup %3128  ;;  %v2184_v14 = vmul.f32 %v2120_v5, %v1943_v63  ;;  %v1954_v13 = vand.u32 2147483647, %v4715_v34  ;;  %3130 = vrcp.f32 %v4784_v60 }
 0x18b   : > { %v1503_v58 = vsel %vm4773_vm3, %v4711_v59, %v1499_v56  ;;  %v1268_v62 = vsel %vm4755_vm1, %v1267_v29, %v1263_v31  ;;  %vm1681_vm5 = vweird.f32 %v4740_v16  ;;  %v1946_v17 = vmul.f32 %v3129_v0, %v4715_v34 }
 0x18c   : > { %v1679_v30 = vadd.f32 %v4740_v16, %v1678_v41  ;;  %v4810_v26 = vadd.f32 %v2286_v37, %v4585_v11  ;;  %vm4812_vm6 = vcmp.eq.f32.partialorder %v1684_v20, 8.507059e+37  ;;  %v1687_v59 = vor.u32 1.1754944e-38, %v1686_v33  ;;  %vm4827_vm8 = vmor %vm1680_vm4, %vm1681_vm5 }
 0x18d   : > { %v1956_v45 = vand.u32 2147483648, %v4715_v34  ;;  %v1508_v44 = vsel %vm4763_vm2, %v1507_v8, %v1503_v58  ;;  %v1947_v7 = vsub.f32 1.0, %v1946_v17  ;;  %vm1950_vm7 = vweird.f32 %v4715_v34  ;;  %v789_v8 = vpop.f32.mrf.mxu2 }
 0x18e   : > { %v2798_v38 = vmul.f32 -1.442695, %v757_v25  ;;  %v4821_v46 = vsel %vm583_vm0, %v2184_v14, 0.0  ;;  %v2139_v11 = vmul.f32 %v2075_v50, %v1268_v62  ;;  %vm4831_vm9 = vcmp.eq.f32.partialorder %v1954_v13, 8.507059e+37 }
 0x18f   : > { %v2076_v47 = vunpack.c.h.bf16 %v4633_v22  ;;  %v1683_v29 = vsel %vm4827_vm8, %v4740_v16, %v1679_v30  ;;  %v1948_v43 = vmul.f32 %v3129_v0, %v1947_v7  ;;  %vm1951_vm10 = vweird.f32 %v3129_v0 }
 0x190   : > { %3132 = vpow2.f32 %v2798_v38  ;;  %v4839_v50 = vpop.eup %3130  ;;  %v2155_v61 = vmul.f32 %v2091_v6, %v1508_v44  ;;  %v1957_v49 = vor.u32 1.1754944e-38, %v1956_v45  ;;  %v787_v51 = vadd.f32 %v4794_v1, %v786_v15  ;;  %vm4853_vm12 = vmor %vm1950_vm7, %vm1951_vm10 }
 0x191   : > { %v832_v18 = vadd.f32 %v4794_v1, %v831_v19  ;;  %v1949_v35 = vadd.f32 %v3129_v0, %v1948_v43  ;;  %v1271_v63 = vmul.f32 %v4839_v50, %v4784_v60  ;;  %vm1275_vm11 = vweird.f32 %v4784_v60 }
 0x192   : > { %v1279_v16 = vand.u32 2147483647, %v4784_v60  ;;  %v1688_v40 = vsel %vm4812_vm6, %v1687_v59, %v1683_v29  ;;  %v2810_v15 = vmul.f32 -1.442695, %v787_v51  ;;  %v720_v19 = vadd.f32 %v4794_v1, %v719_v9  ;;  %v4904_v51 = vld [vmem:[%s3390_s14 + $0xa0] sm:$0xff]  }
 0x193   : > { %v2828_v20 = vmul.f32 -1.442695, %v832_v18  ;;  %v1953_v31 = vsel %vm4853_vm12, %v3129_v0, %v1949_v35  ;;  %v1272_v56 = vsub.f32 1.0, %v1271_v63  ;;  %vm1276_vm13 = vweird.f32 %v4839_v50  ;;  %v721_v0 = vpop.f32.mrf.mxu0  ;;  %v4912_v35 = vld [vmem:[%s3390_s14 + $0xe8] sm:$0xff]  }
 0x194   : > { %v790_v33 = vadd.f32 %v4794_v1, %v789_v8  ;;  %v1281_v37 = vand.u32 2147483648, %v4784_v60  ;;  %3134 = vpow2.f32 %v2810_v15  ;;  %v2783_v34 = vmul.f32 -1.442695, %v720_v19  ;;  %vm4871_vm14 = vmor %vm1275_vm11, %vm1276_vm13 }
 0x195   : > { %v835_v41 = vadd.f32 %v4794_v1, %v834_v23  ;;  %v2167_v14 = vmul.f32 %v2103_v53, %v1688_v40  ;;  %v1273_v58 = vmul.f32 %v4839_v50, %v1272_v56  ;;  %3136 = vpow2.f32 %v2828_v20 }
 0x196   : > { %v3133_v25 = vpop.eup %3132  ;;  %v2811_v13 = vmul.f32 -1.442695, %v790_v33  ;;  %v1958_v62 = vsel %vm4831_vm9, %v1957_v49, %v1953_v31  ;;  %3138 = vpow2.f32 %v2783_v34  ;;  %v2217_v53 = vsel %vm583_vm0, %v2139_v11, 0.0  ;;  %v4901_v49 = vld [vmem:[%s3390_s14 + $0x30] sm:$0xff]  }
 0x197   : > { %v4875_v17 = vadd.f32 1.0, %v3133_v25  ;;  %v2829_v9 = vmul.f32 -1.442695, %v835_v41  ;;  %v2259_v5 = vsel %vm583_vm0, %v2155_v61, 0.0  ;;  %v1274_v59 = vadd.f32 %v4839_v50, %v1273_v58 }
 0x198   : > { %3140 = vpow2.f32 %v2811_v13  ;;  %vm4880_vm15 = vcmp.eq.f32.partialorder %v1279_v16, 8.507059e+37  ;;  %v1282_v60 = vor.u32 1.1754944e-38, %v1281_v37  ;;  %v722_v44 = vadd.f32 %v4794_v1, %v721_v0 }
 0x199   : > { %3142 = vrcp.f32 %v4875_v17  ;;  %v2288_v7 = vsel %vm583_vm0, %v2167_v14, 0.0  ;;  %v2185_v38 = vmul.f32 %v2121_v39, %v1958_v62  ;;  %v1278_v11 = vsel %vm4871_vm14, %v4839_v50, %v1274_v59 }
 0x19a   : > { %3144 = vpow2.f32 %v2829_v9  ;;  %v3135_v32 = vpop.eup %3134  ;;  %v4893_v52 = vadd.f32 %v2217_v53, %v4694_v24  ;;  %v4896_v29 = vadd.f32 %v2259_v5, %v4787_v54  ;;  %v2092_v43 = vunpack.c.h.bf16 %v4636_v36  ;;  %v791_v54 = vpop.f32.mrf.mxu2 }
 0x19b   : > { %v2104_v61 = vunpack.c.h.bf16 %v4654_v10  ;;  %v3137_v39 = vpop.eup %3136  ;;  %v1519_v18 = vand.u32 2147483647, %v4875_v17  ;;  %v1521_v50 = vand.u32 2147483648, %v4875_v17  ;;  %v4908_v8 = vadd.f32 1.0, %v3135_v32  ;;  %v2896_v32 = vld [vmem:[%s5451_s3 + $0x18] sm:$0xff] }
 0x19c   : > { %v2122_v24 = vunpack.c.h.bf16 %v4666_v55  ;;  %v3139_v63 = vpop.eup %3138  ;;  %v4915_v16 = vadd.f32 %v2288_v7, %v4810_v26  ;;  %v1283_v23 = vsel %vm4880_vm15, %v1282_v60, %v1278_v11  ;;  %v4919_v40 = vadd.f32 1.0, %v3137_v39  ;;  %2451 = vmatpush.bf16.msrb.mxu1 %v2896_v32 }
 0x19d   : > { %v2784_v6 = vmul.f32 -1.442695, %v722_v44  ;;  %v4922_v20 = vsel %vm583_vm0, %v2185_v38, 0.0  ;;  %3146 = vrcp.f32 %v4908_v8  ;;  %v2077_v19 = vunpack.c.l.bf16 %v4901_v49 }
 0x19e   : > { %v3141_v15 = vpop.eup %3140  ;;  %v2105_v31 = vunpack.c.l.bf16 %v4904_v51  ;;  %vm1515_vm1 = vweird.f32 %v4875_v17  ;;  %3148 = vrcp.f32 %v4919_v40  ;;  %v2123_v26 = vunpack.c.l.bf16 %v4912_v35 }
 0x19f   : > { %v3143_v56 = vpop.eup %3142  ;;  %v792_v33 = vadd.f32 %v4794_v1, %v791_v54  ;;  %v2140_v34 = vmul.f32 %v2076_v47, %v1283_v23  ;;  %vm4934_vm2 = vcmp.eq.f32.partialorder %v1519_v18, 8.507059e+37  ;;  %v1522_v14 = vor.u32 1.1754944e-38, %v1521_v50 }
 0x1a0   : > { %v3145_v37 = vpop.eup %3144  ;;  %v1511_v41 = vmul.f32 %v3143_v56, %v4875_v17  ;;  %v1699_v58 = vand.u32 2147483647, %v4908_v8  ;;  %v4939_v13 = vadd.f32 1.0, %v3139_v63  ;;  %v4941_v0 = vadd.f32 1.0, %v3141_v15  ;;  %v4979_v15 = vpop.f32.mrf.mxu3 }
 0x1a1   : > { %3150 = vpow2.f32 %v2784_v6  ;;  %vm1516_vm3 = vweird.f32 %v3143_v56  ;;  %v1701_v30 = vand.u32 2147483648, %v4908_v8  ;;  %v1969_v22 = vand.u32 2147483647, %v4919_v40 }
 0x1a2   : > { %v1512_v62 = vsub.f32 1.0, %v1511_v41  ;;  %v1971_v47 = vand.u32 2147483648, %v4919_v40  ;;  %3152 = vrcp.f32 %v4939_v13  ;;  %v4947_v9 = vadd.f32 1.0, %v3145_v37  ;;  %vm4958_vm5 = vmor %vm1515_vm1, %vm1516_vm3  ;;  %v794_v38 = vpop.f32.mrf.mxu2 }
 0x1a3   : > { %v4949_v53 = vmul.f32 -1.442695, %v792_v33  ;;  %v3147_v5 = vpop.eup %3146  ;;  %v4952_v59 = vsel %vm583_vm0, %v2140_v34, 0.0  ;;  %vm1695_vm4 = vweird.f32 %v4908_v8  ;;  %3154 = vrcp.f32 %v4941_v0 }
 0x1a4   : > { %v1513_v45 = vmul.f32 %v3143_v56, %v1512_v62  ;;  %v3149_v60 = vpop.eup %3148  ;;  %v1691_v7 = vmul.f32 %v3147_v5, %v4908_v8  ;;  %vm4963_vm6 = vcmp.eq.f32.partialorder %v1699_v58, 8.507059e+37  ;;  %vm1965_vm7 = vweird.f32 %v4919_v40 }
 0x1a5   : > { %v1294_v11 = vand.u32 2147483647, %v4939_v13  ;;  %v1702_v17 = vor.u32 1.1754944e-38, %v1701_v30  ;;  %v1961_v18 = vmul.f32 %v3149_v60, %v4919_v40  ;;  %vm4973_vm8 = vcmp.eq.f32.partialorder %v1969_v22, 8.507059e+37 }
 0x1a6   : > { %v1514_v39 = vadd.f32 %v3143_v56, %v1513_v45  ;;  %v1692_v63 = vsub.f32 1.0, %v1691_v7  ;;  %v1972_v23 = vor.u32 1.1754944e-38, %v1971_v47  ;;  %v1296_v6 = vand.u32 2147483648, %v4939_v13 }
 0x1a7   : > { %v3151_v54 = vpop.eup %3150  ;;  %3156 = vrcp.f32 %v4947_v9  ;;  %vm1696_vm9 = vweird.f32 %v3147_v5  ;;  %v1962_v37 = vsub.f32 1.0, %v1961_v18  ;;  %vm1290_vm10 = vweird.f32 %v4939_v13 }
 0x1a8   : > { %v1518_v33 = vsel %vm4958_vm5, %v3143_v56, %v1514_v39  ;;  %v3153_v34 = vpop.eup %3152  ;;  %v1693_v58 = vmul.f32 %v3147_v5, %v1692_v63  ;;  %vm4986_vm11 = vcmp.eq.f32.partialorder %v1294_v11, 8.507059e+37  ;;  %vm1710_vm12 = vweird.f32 %v4941_v0  ;;  %vm1697_vm14 = vmor %vm1695_vm4, %vm1696_vm9 }
 0x1a9   : > { %v1523_v41 = vsel %vm4934_vm2, %v1522_v14, %v1518_v33  ;;  %v1714_v30 = vand.u32 2147483647, %v4941_v0  ;;  %v3155_v22 = vpop.eup %3154  ;;  %v1963_v47 = vmul.f32 %v3149_v60, %v1962_v37  ;;  %vm1966_vm13 = vweird.f32 %v3149_v60 }
 0x1aa   : > { %v2156_v56 = vmul.f32 %v2092_v43, %v1523_v41  ;;  %v1286_v45 = vmul.f32 %v3153_v34, %v4939_v13  ;;  %v1694_v44 = vadd.f32 %v3147_v5, %v1693_v58  ;;  %v1297_v25 = vor.u32 1.1754944e-38, %v1296_v6  ;;  %vm1967_vm1 = vmor %vm1965_vm7, %vm1966_vm13  ;;  %v724_v58 = vpop.f32.mrf.mxu0 }
 0x1ab   : > { %v1706_v14 = vmul.f32 %v3155_v22, %v4941_v0  ;;  %v1716_v7 = vand.u32 2147483648, %v4941_v0  ;;  %v1964_v32 = vadd.f32 %v3149_v60, %v1963_v47  ;;  %vm1291_vm15 = vweird.f32 %v3153_v34 }
 0x1ac   : > { %v2261_v11 = vsel %vm583_vm0, %v2156_v56, 0.0  ;;  %v1287_v39 = vsub.f32 1.0, %v1286_v45  ;;  %v1698_v18 = vsel %vm1697_vm14, %v3147_v5, %v1694_v44  ;;  %v5004_v6 = vadd.f32 1.0, %v3151_v54  ;;  %vm5014_vm2 = vmor %vm1290_vm10, %vm1291_vm15 }
 0x1ad   : > { %v3157_v36 = vpop.eup %3156  ;;  %v2262_v43 = vadd.f32 %v2261_v11, %v4896_v29  ;;  %v1707_v63 = vsub.f32 1.0, %v1706_v14  ;;  %v1703_v33 = vsel %vm4963_vm6, %v1702_v17, %v1698_v18  ;;  %v1968_v37 = vsel %vm1967_vm1, %v3149_v60, %v1964_v32 }
 0x1ae   : > { %v1288_v41 = vmul.f32 %v3153_v34, %v1287_v39  ;;  %v1976_v8 = vmul.f32 %v3157_v36, %v4947_v9  ;;  %v1973_v29 = vsel %vm4973_vm8, %v1972_v23, %v1968_v37  ;;  %vm1711_vm3 = vweird.f32 %v3155_v22  ;;  %v839_v23 = vpop.f32.mrf.mxu3 }
 0x1af   : > { %v2264_v56 = vadd.f32 %v3698_v27, %v2262_v43  ;;  %v1708_v5 = vmul.f32 %v3155_v22, %v1707_v63  ;;  %v2168_v60 = vmul.f32 %v2104_v61, %v1703_v33  ;;  %vm1980_vm4 = vweird.f32 %v4947_v9  ;;  %vm1712_vm5 = vmor %vm1710_vm12, %vm1711_vm3  ;;  %v796_v33 = vpop.f32.mrf.mxu2 }
 0x1b0   : > { %v1289_v17 = vadd.f32 %v3153_v34, %v1288_v41  ;;  %v1977_v54 = vsub.f32 1.0, %v1976_v8  ;;  %v2186_v50 = vmul.f32 %v2122_v24, %v1973_v29  ;;  %3158 = vrcp.f32 %v5004_v6 }
 0x1b1   : > { %v2266_v27 = vadd.f32 %v3783_v2, %v2264_v56  ;;  %v1709_v13 = vadd.f32 %v3155_v22, %v1708_v5  ;;  %vm1981_vm6 = vweird.f32 %v3157_v36  ;;  %v1984_v61 = vand.u32 2147483647, %v4947_v9 }
 0x1b2   : > { %v1293_v47 = vsel %vm5014_vm2, %v3153_v34, %v1289_v17  ;;  %v1978_v10 = vmul.f32 %v3157_v36, %v1977_v54  ;;  %v1717_v55 = vor.u32 1.1754944e-38, %v1716_v7  ;;  %v1986_v24 = vand.u32 2147483648, %v4947_v9  ;;  %vm5040_vm8 = vmor %vm1980_vm4, %vm1981_vm6 }
 0x1b3   : > { %v5031_v45 = vadd.f32 %v4407_v48, %v2266_v27  ;;  %v1713_v2 = vsel %vm1712_vm5, %v3155_v22, %v1709_v13  ;;  %v2290_v44 = vsel %vm583_vm0, %v2168_v60, 0.0  ;;  %v1298_v14 = vsel %vm4986_vm11, %v1297_v25, %v1293_v47 }
 0x1b4   : > { %vm1715_vm7 = vcmp.eq.f32.partialorder %v1714_v30, 8.507059e+37  ;;  %v1979_v34 = vadd.f32 %v3157_v36, %v1978_v10  ;;  %v2341_v0 = vsel %vm583_vm0, %v2186_v50, 0.0  ;;  %v837_v48 = vadd.f32 %v4794_v1, %v4979_v15 }
 0x1b5   : > { %v1718_v11 = vsel %vm1715_vm7, %v1717_v55, %v1713_v2  ;;  %v725_v22 = vadd.f32 %v4794_v1, %v724_v58  ;;  %v2220_v62 = vadd.f32 %v4952_v59, %v4893_v52  ;;  %v2078_v25 = vunpack.c.h.bf16 %v4901_v49  ;;  %v5093_v2 = vld [vmem:[%s3390_s14 + $0x38] sm:$0xff]  }
 0x1b6   : > { %v1983_v30 = vsel %vm5040_vm8, %v3157_v36, %v1979_v34  ;;  %3160 = vpow2.f32 %v4949_v53  ;;  %v3159_v9 = vpop.eup %3158  ;;  %v5054_v7 = vadd.f32 %v2290_v44, %v4915_v16  ;;  %v2141_v39 = vmul.f32 %v2077_v19, %v1298_v14  ;;  %v726_v36 = vpop.f32.mrf.mxu0 }
 0x1b7   : > { %vm1985_vm9 = vcmp.eq.f32.partialorder %v1984_v61, 8.507059e+37  ;;  %v1987_v15 = vor.u32 1.1754944e-38, %v1986_v24  ;;  %v2342_v43 = vadd.f32 %v2341_v0, %v4922_v20  ;;  %v2169_v52 = vmul.f32 %v2105_v31, %v1718_v11  ;;  %v841_v58 = vpop.f32.mrf.mxu3  ;;  %v5101_v0 = vld [vmem:[%s3390_s14 + $0xa8] sm:$0xff]   ;;  %v5104_v11 = vld [vmem:[%s3390_s14 + $0xf0] sm:$0xff]  }
 0x1b8   : > { %v1301_v59 = vmul.f32 %v3159_v9, %v5004_v6  ;;  %vm1305_vm10 = vweird.f32 %v5004_v6  ;;  %v1309_v18 = vand.u32 2147483647, %v5004_v6  ;;  %v2830_v16 = vmul.f32 -1.442695, %v837_v48 }
 0x1b9   : > { %v1988_v53 = vsel %vm1985_vm9, %v1987_v15, %v1983_v30  ;;  %v2785_v63 = vmul.f32 -1.442695, %v725_v22  ;;  %vm1306_vm11 = vweird.f32 %v3159_v9  ;;  %v1311_v19 = vand.u32 2147483648, %v5004_v6 }
 0x1ba   : > { %v1302_v37 = vsub.f32 1.0, %v1301_v59  ;;  %v795_v20 = vadd.f32 %v4794_v1, %v794_v38  ;;  %v2221_v41 = vsel %vm583_vm0, %v2141_v39, 0.0  ;;  %3162 = vpow2.f32 %v2830_v16  ;;  %vm5073_vm12 = vmor %vm1305_vm10, %vm1306_vm11 }
 0x1bb   : > { %v840_v31 = vadd.f32 %v4794_v1, %v839_v23  ;;  %v727_v8 = vadd.f32 %v4794_v1, %v726_v36  ;;  %v2187_v29 = vmul.f32 %v2123_v26, %v1988_v53  ;;  %3164 = vpow2.f32 %v2785_v63 }
 0x1bc   : > { %v3161_v56 = vpop.eup %3160  ;;  %v1303_v40 = vmul.f32 %v3159_v9, %v1302_v37  ;;  %v2813_v5 = vmul.f32 -1.442695, %v795_v20  ;;  %v797_v27 = vadd.f32 %v4794_v1, %v796_v33  ;;  %v1312_v13 = vor.u32 1.1754944e-38, %v1311_v19 }
 0x1bd   : > { %v5077_v60 = vadd.f32 1.0, %v3161_v56  ;;  %v2831_v17 = vmul.f32 -1.442695, %v840_v31  ;;  %v2786_v54 = vmul.f32 -1.442695, %v727_v8  ;;  %v842_v26 = vadd.f32 %v4794_v1, %v841_v58 }
 0x1be   : > { %v1304_v50 = vadd.f32 %v3159_v9, %v1303_v40  ;;  %3166 = vpow2.f32 %v2813_v5  ;;  %v2292_v6 = vrot.slane %v5054_v7, 4  ;;  %vm5082_vm13 = vcmp.eq.f32.partialorder %v1309_v18, 8.507059e+37 }
 0x1bf   : > { %3168 = vrcp.f32 %v5077_v60  ;;  %v2106_v47 = vunpack.c.h.bf16 %v4904_v51  ;;  %v5088_v10 = vadd.f32 %v2221_v41, %v2220_v62  ;;  %v2814_v55 = vmul.f32 -1.442695, %v797_v27  ;;  %v844_v37 = vpop.f32.mrf.mxu3 }
 0x1c0   : > { %v1308_v61 = vsel %vm5073_vm12, %v3159_v9, %v1304_v50  ;;  %3170 = vpow2.f32 %v2831_v17  ;;  %v3163_v24 = vpop.eup %3162  ;;  %v5096_v44 = vsel %vm583_vm0, %v2169_v52, 0.0  ;;  %v2343_v14 = vsel %vm583_vm0, %v2187_v29, 0.0  ;;  %v799_v52 = vpop.f32.mrf.mxu2 }
 0x1c1   : > { %v1729_v34 = vand.u32 2147483647, %v5077_v60  ;;  %3172 = vpow2.f32 %v2786_v54  ;;  %v3165_v32 = vpop.eup %3164  ;;  %v1313_v48 = vsel %vm5082_vm13, %v1312_v13, %v1308_v61  ;;  %v1731_v22 = vand.u32 2147483648, %v5077_v60 }
 0x1c2   : > { %v5109_v62 = vadd.f32 1.0, %v3163_v24  ;;  %v2832_v30 = vmul.f32 -1.442695, %v842_v26  ;;  %v2124_v9 = vunpack.c.h.bf16 %v4912_v35  ;;  %v5112_v39 = vadd.f32 1.0, %v3165_v32 }
 0x1c3   : > { %v2079_v15 = vunpack.c.l.bf16 %v5093_v2  ;;  %3174 = vpow2.f32 %v2814_v55  ;;  %v5115_v36 = vadd.f32 %v2343_v14, %v2342_v43  ;;  %v2107_v53 = vunpack.c.l.bf16 %v5101_v0 }
 0x1c4   : > { %v3167_v59 = vpop.eup %3166  ;;  %3176 = vrcp.f32 %v5109_v62  ;;  %v2125_v18 = vunpack.c.l.bf16 %v5104_v11  ;;  %v2142_v63 = vmul.f32 %v2078_v25, %v1313_v48  ;;  %vm1725_vm14 = vweird.f32 %v5077_v60 }
 0x1c5   : > { %v3169_v16 = vpop.eup %3168  ;;  %3178 = vrcp.f32 %v5112_v39  ;;  %v2080_v33 = vunpack.c.h.bf16 %v5093_v2  ;;  %vm5126_vm15 = vcmp.eq.f32.partialorder %v1729_v34, 8.507059e+37  ;;  %v1732_v41 = vor.u32 1.1754944e-38, %v1731_v22 }
 0x1c6   : > { %v3171_v19 = vpop.eup %3170  ;;  %v1721_v43 = vmul.f32 %v3169_v16, %v5077_v60  ;;  %3180 = vpow2.f32 %v2832_v30  ;;  %v800_v31 = vadd.f32 %v4794_v1, %v799_v52  ;;  %v1999_v25 = vand.u32 2147483647, %v5109_v62 }
 0x1c7   : > { %v3173_v49 = vpop.eup %3172  ;;  %v2001_v8 = vand.u32 2147483648, %v5109_v62  ;;  %v5133_v58 = vadd.f32 1.0, %v3167_v59  ;;  %v5135_v56 = vadd.f32 1.0, %v3171_v19  ;;  %v1324_v40 = vand.u32 2147483647, %v5112_v39 }
 0x1c8   : > { %v1722_v29 = vsub.f32 1.0, %v1721_v43  ;;  %v5139_v5 = vadd.f32 %v4794_v1, %v844_v37  ;;  %v5144_v38 = vadd.f32 %v2212_v42, %v4475_v4  ;;  %v5147_v54 = vsel %vm583_vm0, %v2142_v63, 0.0 }
 0x1c9   : > { %v3175_v17 = vpop.eup %3174  ;;  %v1326_v27 = vand.u32 2147483648, %v5112_v39  ;;  %3182 = vrcp.f32 %v5133_v58  ;;  %v5151_v50 = vadd.f32 1.0, %v3173_v49  ;;  %vm1726_vm1 = vweird.f32 %v3169_v16 }
 0x1ca   : > { %v3177_v13 = vpop.eup %3176  ;;  %v1723_v26 = vmul.f32 %v3169_v16, %v1722_v29  ;;  %vm1995_vm2 = vweird.f32 %v5109_v62  ;;  %3184 = vrcp.f32 %v5135_v56  ;;  %vm5156_vm3 = vcmp.eq.f32.partialorder %v1999_v25, 8.507059e+37  ;;  %vm1727_vm6 = vmor %vm1725_vm14, %vm1726_vm1 }
 0x1cb   : > { %v3179_v23 = vpop.eup %3178  ;;  %v1991_v4 = vmul.f32 %v3177_v13, %v5109_v62  ;;  %v2002_v61 = vor.u32 1.1754944e-38, %v2001_v8  ;;  %vm1320_vm4 = vweird.f32 %v5112_v39  ;;  %vm5164_vm5 = vcmp.eq.f32.partialorder %v1324_v40, 8.507059e+37 }
 0x1cc   : > { %v5161_v55 = vpop.eup %3180  ;;  %v1724_v24 = vadd.f32 %v3169_v16, %v1723_v26  ;;  %v1316_v14 = vmul.f32 %v3179_v23, %v5112_v39  ;;  %v1744_v32 = vand.u32 2147483647, %v5133_v58  ;;  %v1327_v22 = vor.u32 1.1754944e-38, %v1326_v27 }
 0x1cd   : > { %v1992_v48 = vsub.f32 1.0, %v1991_v4  ;;  %3186 = vrcp.f32 %v5151_v50  ;;  %v5172_v30 = vmul.f32 -1.442695, %v800_v31  ;;  %vm1321_vm7 = vweird.f32 %v3179_v23  ;;  %v2895_v4 = vld [vmem:[%s5451_s3 + $0x10] sm:$0xff] }
 0x1ce   : > { %v1728_v52 = vsel %vm1727_vm6, %v3169_v16, %v1724_v24  ;;  %v1317_v59 = vsub.f32 1.0, %v1316_v14  ;;  %vm1740_vm8 = vweird.f32 %v5133_v58  ;;  %v1746_v63 = vand.u32 2147483648, %v5133_v58  ;;  %vm5187_vm12 = vmor %vm1320_vm4, %vm1321_vm7  ;;  %2452 = vmatpush.bf16.msrb.mxu1 %v2895_v4  ;;  %v801_v4 = vpop.f32.mrf.mxu2 }
 0x1cf   : > { %v3183_v37 = vpop.eup %3182  ;;  %v1733_v19 = vsel %vm5126_vm15, %v1732_v41, %v1728_v52  ;;  %v1993_v43 = vmul.f32 %v3177_v13, %v1992_v48  ;;  %vm1996_vm9 = vweird.f32 %v3177_v13  ;;  %vm2010_vm10 = vweird.f32 %v5135_v56 }
 0x1d0   : > { %v3185_v60 = vpop.eup %3184  ;;  %v1318_v49 = vmul.f32 %v3179_v23, %v1317_v59  ;;  %v1736_v31 = vmul.f32 %v3183_v37, %v5133_v58  ;;  %vm5180_vm11 = vcmp.eq.f32.partialorder %v1744_v32, 8.507059e+37  ;;  %v2014_v25 = vand.u32 2147483647, %v5135_v56  ;;  %vm1997_vm14 = vmor %vm1995_vm2, %vm1996_vm9 }
 0x1d1   : > { %v1994_v8 = vadd.f32 %v3177_v13, %v1993_v43  ;;  %v2006_v41 = vmul.f32 %v3185_v60, %v5135_v56  ;;  %v2016_v29 = vand.u32 2147483648, %v5135_v56  ;;  %vm1335_vm13 = vweird.f32 %v5151_v50 }
 0x1d2   : > { %v2170_v40 = vmul.f32 %v2106_v47, %v1733_v19  ;;  %v1319_v27 = vadd.f32 %v3179_v23, %v1318_v49  ;;  %v1737_v26 = vsub.f32 1.0, %v1736_v31  ;;  %v1339_v39 = vand.u32 2147483647, %v5151_v50 }
 0x1d3   : > { %v3187_v24 = vpop.eup %3186  ;;  %v1998_v14 = vsel %vm1997_vm14, %v3177_v13, %v1994_v8  ;;  %vm1741_vm15 = vweird.f32 %v3183_v37  ;;  %v2007_v32 = vsub.f32 1.0, %v2006_v41  ;;  %v5202_v48 = vadd.f32 1.0, %v3175_v17 }
 0x1d4   : > { %v2003_v51 = vsel %vm5156_vm3, %v2002_v61, %v1998_v14  ;;  %v1323_v47 = vsel %vm5187_vm12, %v3179_v23, %v1319_v27  ;;  %v1738_v62 = vmul.f32 %v3183_v37, %v1737_v26  ;;  %v1331_v52 = vmul.f32 %v3187_v24, %v5151_v50  ;;  %vm1742_vm3 = vmor %vm1740_vm8, %vm1741_vm15 }
 0x1d5   : > { %v1328_v59 = vsel %vm5164_vm5, %v1327_v22, %v1323_v47  ;;  %v2008_v19 = vmul.f32 %v3185_v60, %v2007_v32  ;;  %vm2011_vm1 = vweird.f32 %v3185_v60  ;;  %v1341_v13 = vand.u32 2147483648, %v5151_v50 }
 0x1d6   : > { %v1739_v43 = vadd.f32 %v3183_v37, %v1738_v62  ;;  %v1332_v17 = vsub.f32 1.0, %v1331_v52  ;;  %vm1336_vm2 = vweird.f32 %v3187_v24  ;;  %3188 = vrcp.f32 %v5202_v48  ;;  %vm2012_vm4 = vmor %vm2010_vm10, %vm2011_vm1 }
 0x1d7   : > { %v2188_v42 = vmul.f32 %v2124_v9, %v2003_v51  ;;  %v1747_v23 = vor.u32 1.1754944e-38, %v1746_v63  ;;  %v2009_v61 = vadd.f32 %v3185_v60, %v2008_v19  ;;  %v2017_v34 = vor.u32 1.1754944e-38, %v2016_v29  ;;  %vm5228_vm6 = vmor %vm1335_vm13, %vm1336_vm2 }
 0x1d8   : > { %v2299_v22 = vsel %vm583_vm0, %v2170_v40, 0.0  ;;  %v2143_v49 = vmul.f32 %v2079_v15, %v1328_v59  ;;  %v1743_v31 = vsel %vm1742_vm3, %v3183_v37, %v1739_v43  ;;  %v1333_v8 = vmul.f32 %v3187_v24, %v1332_v17 }
 0x1d9   : > { %v1748_v35 = vsel %vm5180_vm11, %v1747_v23, %v1743_v31  ;;  %v2013_v9 = vsel %vm2012_vm4, %v3185_v60, %v2009_v61  ;;  %vm2015_vm5 = vcmp.eq.f32.partialorder %v2014_v25, 8.507059e+37  ;;  %v1342_v63 = vor.u32 1.1754944e-38, %v1341_v13  ;;  %v5277_v23 = vld [vmem:[%s3390_s14 + $0xb0] sm:$0xff]   ;;  %v5280_v61 = vld [vmem:[%s3390_s14 + $0xf8] sm:$0xff]  }
 0x1da   : > { %v2224_v15 = vadd.f32 %v5147_v54, %v5088_v10  ;;  %v2018_v37 = vsel %vm2015_vm5, %v2017_v34, %v2013_v9  ;;  %v1334_v56 = vadd.f32 %v3187_v24, %v1333_v8  ;;  %vm1340_vm7 = vcmp.eq.f32.partialorder %v1339_v39, 8.507059e+37 }
 0x1db   : > { %v2300_v20 = vadd.f32 %v2299_v22, %v5096_v44  ;;  %v2345_v16 = vsel %vm583_vm0, %v2188_v42, 0.0  ;;  %v1759_v60 = vand.u32 2147483647, %v5202_v48  ;;  %v5238_v25 = vadd.f32 1.0, %v5161_v55 }
 0x1dc   : > { %v3189_v50 = vpop.eup %3188  ;;  %v2225_v41 = vsel %vm583_vm0, %v2143_v49, 0.0  ;;  %v2171_v29 = vmul.f32 %v2107_v53, %v1748_v35  ;;  %v1338_v10 = vsel %vm5228_vm6, %v3187_v24, %v1334_v56  ;;  %3190 = vpow2.f32 %v5172_v30  ;;  %v846_v24 = vpop.f32.mrf.mxu3 }
 0x1dd   : > { %v2189_v44 = vmul.f32 %v2125_v18, %v2018_v37  ;;  %v1343_v54 = vsel %vm1340_vm7, %v1342_v63, %v1338_v10  ;;  %v1751_v40 = vmul.f32 %v3189_v50, %v5202_v48  ;;  %vm1755_vm8 = vweird.f32 %v5202_v48 }
 0x1de   : > { %v2346_v55 = vadd.f32 %v2345_v16, %v5115_v36  ;;  %v2144_v27 = vmul.f32 %v2080_v33, %v1343_v54  ;;  %v1761_v53 = vand.u32 2147483648, %v5202_v48  ;;  %3192 = vrcp.f32 %v5238_v25 }
 0x1df   : > { %v2226_v26 = vadd.f32 %v2225_v41, %v2224_v15  ;;  %v1752_v39 = vsub.f32 1.0, %v1751_v40  ;;  %vm5255_vm9 = vcmp.eq.f32.partialorder %v1759_v60, 8.507059e+37  ;;  %v2108_v18 = vunpack.c.h.bf16 %v5101_v0 }
 0x1e0   : > { %v2301_v14 = vsel %vm583_vm0, %v2171_v29, 0.0  ;;  %v2227_v36 = vsel %vm583_vm0, %v2144_v27, 0.0  ;;  %v2126_v2 = vunpack.c.h.bf16 %v5104_v11  ;;  %v2833_v33 = vmul.f32 -1.442695, %v5139_v5  ;;  %v2893_v29 = vld [vmem:[%s5451_s3] sm:$0xff] }
 0x1e1   : > { %v2347_v32 = vsel %vm583_vm0, %v2189_v44, 0.0  ;;  %v2228_v51 = vadd.f32 %v2227_v36, %v2226_v26  ;;  %v1753_v47 = vmul.f32 %v3189_v50, %v1752_v39  ;;  %vm1756_vm10 = vweird.f32 %v3189_v50 }
 0x1e2   : > { %v3191_v62 = vpop.eup %3190  ;;  %v1762_v52 = vor.u32 1.1754944e-38, %v1761_v53  ;;  %3194 = vpow2.f32 %v2833_v33  ;;  %v802_v0 = vadd.f32 %v4794_v1, %v801_v4  ;;  %v847_v59 = vadd.f32 %v4794_v1, %v846_v24  ;;  %vm1757_vm11 = vmor %vm1755_vm8, %vm1756_vm10 }
 0x1e3   : > { %v5267_v19 = vadd.f32 %v2301_v14, %v2300_v20  ;;  %v2229_v13 = vrot.slane %v2228_v51, 4  ;;  %v1754_v43 = vadd.f32 %v3189_v50, %v1753_v47  ;;  %v5269_v17 = vadd.f32 1.0, %v3191_v62 }
 0x1e4   : > { %v3193_v5 = vpop.eup %3192  ;;  %v5271_v42 = vadd.f32 %v2347_v32, %v2346_v55  ;;  %vm2025_vm12 = vweird.f32 %v5238_v25  ;;  %v2816_v34 = vmul.f32 -1.442695, %v802_v0  ;;  %v2270_v1 = vadd.f32 %v4598_v21, %v5031_v45  ;;  %v2894_v45 = vld [vmem:[%s5451_s3 + $0x8] sm:$0xff] }
 0x1e5   : > { %v2230_v22 = vadd.f32 %v2229_v13, %v2228_v51  ;;  %v1758_v49 = vsel %vm1757_vm11, %v3189_v50, %v1754_v43  ;;  %v2021_v31 = vmul.f32 %v3193_v5, %v5238_v25  ;;  %v2029_v8 = vand.u32 2147483647, %v5238_v25  ;;  %2453 = vmatpush.bf16.msrb.mxu1 %v2894_v45 }
 0x1e6   : > { %v1763_v48 = vsel %vm5255_vm9, %v1762_v52, %v1758_v49  ;;  %v2031_v35 = vand.u32 2147483648, %v5238_v25  ;;  %3196 = vrcp.f32 %v5269_v17  ;;  %v2834_v9 = vmul.f32 -1.442695, %v847_v59 }
 0x1e7   : > { %v2231_v58 = vrot.slane %v2230_v22, 2  ;;  %v2022_v63 = vsub.f32 1.0, %v2021_v31  ;;  %v2109_v15 = vunpack.c.l.bf16 %v5277_v23  ;;  %v2127_v21 = vunpack.c.l.bf16 %v5280_v61 }
 0x1e8   : > { %v3195_v37 = vpop.eup %3194  ;;  %vm2026_vm13 = vweird.f32 %v3193_v5  ;;  %3198 = vpow2.f32 %v2816_v34  ;;  %v2254_v56 = vrot.slane %v4621_v57, 1  ;;  %v2271_v20 = vrot.slane %v2270_v1, 4 }
 0x1e9   : > { %v2232_v16 = vadd.f32 %v2231_v58, %v2230_v22  ;;  %v2172_v60 = vmul.f32 %v2108_v18, %v1763_v48  ;;  %v2023_v50 = vmul.f32 %v3193_v5, %v2022_v63  ;;  %v1774_v41 = vand.u32 2147483647, %v5269_v17  ;;  %vm2027_vm15 = vmor %vm2025_vm12, %vm2026_vm13  ;;  %2454 = vmatpush.bf16.msrb.mxu1 %v2893_v29 }
 0x1ea   : > { %vm5300_vm14 = vcmp.eq.f32.partialorder %v2029_v8, 8.507059e+37  ;;  %v5304_v44 = vadd.f32 1.0, %v3195_v37  ;;  %3200 = vpow2.f32 %v2834_v9  ;;  %v2272_v54 = vadd.f32 %v2271_v20, %v2270_v1 }
 0x1eb   : > { %v2024_v40 = vadd.f32 %v3193_v5, %v2023_v50  ;;  %v2032_v55 = vor.u32 1.1754944e-38, %v2031_v35  ;;  %v2110_v27 = vunpack.c.h.bf16 %v5277_v23  ;;  %v2128_v53 = vunpack.c.h.bf16 %v5280_v61 }
 0x1ec   : > { %v3197_v26 = vpop.eup %3196  ;;  %vm1770_vm1 = vweird.f32 %v5269_v17  ;;  %v1776_v39 = vand.u32 2147483648, %v5269_v17  ;;  %3202 = vrcp.f32 %v5304_v44  ;;  %v2255_v30 = vadd.f32 %v2254_v56, %v4621_v57 }
 0x1ed   : > { %v2233_v18 = vrot.slane %v2232_v16, 1  ;;  %v2303_v4 = vsel %vm583_vm0, %v2172_v60, 0.0  ;;  %v2028_v24 = vsel %vm2027_vm15, %v3193_v5, %v2024_v40  ;;  %v1766_v14 = vmul.f32 %v3197_v26, %v5269_v17 }
 0x1ee   : > { %vm5317_vm2 = vcmp.eq.f32.partialorder %v1774_v41, 8.507059e+37  ;;  %v3199_v25 = vpop.eup %3198  ;;  %v2033_v33 = vsel %vm5300_vm14, %v2032_v55, %v2028_v24  ;;  %v2046_v32 = vand.u32 2147483648, %v5304_v44  ;;  %v2273_v51 = vrot.slane %v2272_v54, 2 }
 0x1ef   : > { %v2293_v57 = vadd.f32 %v2292_v6, %v5054_v7  ;;  %v1767_v47 = vsub.f32 1.0, %v1766_v14  ;;  %v2044_v62 = vand.u32 2147483647, %v5304_v44  ;;  %v5328_v52 = vadd.f32 1.0, %v3199_v25 }
 0x1f0   : > { %v2333_v0 = vadd.f32 %v4821_v46, %v4603_v3  ;;  %v3201_v59 = vpop.eup %3200  ;;  %v5333_v13 = vadd.f32 %v2303_v4, %v5267_v19  ;;  %v2190_v43 = vmul.f32 %v2126_v2, %v2033_v33  ;;  %v1777_v5 = vor.u32 1.1754944e-38, %v1776_v39 }
 0x1f1   : > { %v2274_v34 = vadd.f32 %v2273_v51, %v2272_v54  ;;  %v1768_v1 = vmul.f32 %v3197_v26, %v1767_v47  ;;  %vm1771_vm3 = vweird.f32 %v3197_v26  ;;  %vm2040_vm4 = vweird.f32 %v5304_v44 }
 0x1f2   : > { %3204 = vrcp.f32 %v5328_v52  ;;  %v3203_v7 = vpop.eup %3202  ;;  %v2047_v6 = vor.u32 1.1754944e-38, %v2046_v32  ;;  %v5339_v22 = vadd.f32 1.0, %v3201_v59  ;;  %v2234_v3 = vadd.f32 %v2233_v18, %v2232_v16  ;;  %vm1772_vm6 = vmor %vm1770_vm1, %vm1771_vm3 }
 0x1f3   : > { %v2294_v46 = vrot.slane %v2293_v57, 2  ;;  %v1769_v49 = vadd.f32 %v3197_v26, %v1768_v1  ;;  %v2036_v19 = vmul.f32 %v3203_v7, %v5304_v44  ;;  %vm5342_vm5 = vcmp.eq.f32.partialorder %v2044_v62, 8.507059e+37 }
 0x1f4   : > { %v2275_v2 = vrot.slane %v2274_v34, 1  ;;  %v2334_v31 = vrot.slane %v2333_v0, 4  ;;  %v2349_v8 = vsel %vm583_vm0, %v2190_v43, 0.0  ;;  %v1789_v48 = vand.u32 2147483647, %v5328_v52 }
 0x1f5   : > { %v1791_v35 = vand.u32 2147483648, %v5328_v52  ;;  %3206 = vrcp.f32 %v5339_v22  ;;  %v1773_v9 = vsel %vm1772_vm6, %v3197_v26, %v1769_v49  ;;  %v2037_v58 = vsub.f32 1.0, %v2036_v19 }
 0x1f6   : > { %v2361_v63 = vmul.f32 0.015625, %v5144_v38  ;;  %v2363_v45 = vmul.f32 0.015625, %v2255_v30  ;;  %v1778_v37 = vsel %vm5317_vm2, %v1777_v5, %v1773_v9  ;;  %vm1785_vm7 = vweird.f32 %v5328_v52 }
 0x1f7   : > { %v2276_v56 = vadd.f32 %v2275_v2, %v2274_v34  ;;  %v2295_v20 = vadd.f32 %v2294_v46, %v2293_v57  ;;  %v5357_v16 = vadd.f32 %v2349_v8, %v5271_v42  ;;  %v2173_v60 = vmul.f32 %v2109_v15, %v1778_v37 }
 0x1f8   : > { %v3205_v17 = vpop.eup %3204  ;;  %v2038_v50 = vmul.f32 %v3203_v7, %v2037_v58  ;;  %vm2041_vm8 = vweird.f32 %v3203_v7  ;;  %vm5362_vm9 = vcmp.eq.f32.partialorder %v1789_v48, 8.507059e+37  ;;  %v1792_v29 = vor.u32 1.1754944e-38, %v1791_v35 }
 0x1f9   : > { %v1781_v41 = vmul.f32 %v3205_v17, %v5328_v52  ;;  %v2296_v10 = vrot.slane %v2295_v20, 1  ;;  %vm2055_vm10 = vweird.f32 %v5339_v22  ;;  %v2059_v40 = vand.u32 2147483647, %v5339_v22  ;;  %vm2042_vm11 = vmor %vm2040_vm4, %vm2041_vm8 }
 0x1fa   : > { %v2039_v54 = vadd.f32 %v3203_v7, %v2038_v50  ;;  %v2061_v42 = vand.u32 2147483648, %v5339_v22  ;;  %v2362_v55 = vmul.f32 0.015625, %v2234_v3  ;;  %v2335_v30 = vadd.f32 %v2334_v31, %v2333_v0  ;;  %v2950_v0 = vld [vmem:[%s5453_s5] ss:$0 sm:$0xff] }
 0x1fb   : > { %v3207_v26 = vpop.eup %3206  ;;  %v1782_v15 = vsub.f32 1.0, %v1781_v41  ;;  %v2297_v39 = vadd.f32 %v2296_v10, %v2295_v20  ;;  %v2364_v18 = vmul.f32 0.015625, %v2276_v56  ;;  %v2305_v4 = vsel %vm583_vm0, %v2173_v60, 0.0 }
 0x1fc   : > { %v2043_v24 = vsel %vm2042_vm11, %v3203_v7, %v2039_v54  ;;  %vm1786_vm12 = vweird.f32 %v3205_v17  ;;  %v2051_v14 = vmul.f32 %v3207_v26, %v5339_v22  ;;  %v2369_v32 = vpack.c.bf16 %v2361_v63, %v2361_v63 }
 0x1fd   : > { %v2048_v36 = vsel %vm5342_vm5, %v2047_v6, %v2043_v24  ;;  %v1783_v25 = vmul.f32 %v3205_v17, %v1782_v15  ;;  %v2365_v33 = vmul.f32 0.015625, %v2297_v39  ;;  %v2370_v57 = vpack.c.bf16 %v2362_v55, %v2362_v55  ;;  %vm1787_vm14 = vmor %vm1785_vm7, %vm1786_vm12 }
 0x1fe   : > { %v2191_v44 = vmul.f32 %v2127_v21, %v2048_v36  ;;  %v2052_v51 = vsub.f32 1.0, %v2051_v14  ;;  %v2371_v47 = vpack.c.bf16 %v2363_v45, %v2363_v45  ;;  %vm5377_vm13 = vcmp.eq.f32.partialorder %v2059_v40, 8.507059e+37 }
 0x1ff   : > { %v1784_v62 = vadd.f32 %v3205_v17, %v1783_v25  ;;  %v2062_v59 = vor.u32 1.1754944e-38, %v2061_v42  ;;  %v2372_v43 = vpack.c.bf16 %v2364_v18, %v2364_v18  ;;  %vm2056_vm15 = vweird.f32 %v3207_v26 }
 0x200   : > { %v2053_v5 = vmul.f32 %v3207_v26, %v2052_v51  ;;  %v2336_v34 = vrot.slane %v2335_v30, 2  ;;  %v2398_v1 = vunpack.c.l.b16 %v2370_v57  ;;  %v2306_v7 = vadd.f32 %v2305_v4, %v5333_v13  ;;  %vm2057_vm1 = vmor %vm2055_vm10, %vm2056_vm15  ;;  %v2949_v57 = vld [vmem:[%s5452_s4] ss:$0 sm:$0xff] }
 0x201   : > { %v2351_v21 = vsel %vm583_vm0, %v2191_v44, 0.0  ;;  %v1788_v6 = vsel %vm1787_vm14, %v3205_v17, %v1784_v62  ;;  %v2373_v3 = vpack.c.bf16 %v2365_v33, %v2365_v33  ;;  %v2397_v19 = vunpack.c.l.b16 %v2369_v32 }
 0x202   : > { %v1793_v46 = vsel %vm5362_vm9, %v1792_v29, %v1788_v6  ;;  %v2054_v49 = vadd.f32 %v3207_v26, %v2053_v5  ;;  %v2399_v11 = vunpack.c.l.b16 %v2371_v47  ;;  %v2400_v2 = vunpack.c.l.b16 %v2372_v43 }
 0x203   : > { %v2174_v52 = vmul.f32 %v2110_v27, %v1793_v46  ;;  %vm2405_vm2 = vcmask 1041409   ;;  %vm2407_vm3 = vcmask 1042434   ;;  %vm2409_vm4 = vcmask 1043459  }
 0x204   : > { %v2058_v13 = vsel %vm2057_vm1, %v3207_v26, %v2054_v49  ;;  %v2406_v31 = vsel %vm2405_vm2, %v2398_v1, %v2397_v19  ;;  %vm2411_vm5 = vcmask 1044484   ;;  %v2401_v35 = vunpack.c.l.b16 %v2373_v3 }
 0x205   : > { %v2307_v8 = vsel %vm583_vm0, %v2174_v52, 0.0  ;;  %v2063_v48 = vsel %vm5377_vm13, %v2062_v59, %v2058_v13  ;;  %v2408_v9 = vsel %vm2407_vm3, %v2399_v11, %v2406_v31  ;;  %v2309_v22 = vsel %vm583_vm0, %v3702_v28, 0.0 }
 0x206   : > { %v2308_v58 = vadd.f32 %v2307_v8, %v2306_v7  ;;  %v2192_v23 = vmul.f32 %v2128_v53, %v2063_v48  ;;  %v2410_v27 = vsel %vm2409_vm4, %v2400_v2, %v2408_v9  ;;  %v2352_v63 = vadd.f32 %v2351_v21, %v5357_v16 }
 0x207   : > { %v2412_v45 = vsel %vm2411_vm5, %v2401_v35, %v2410_v27  ;;  %v2311_v20 = vsel %vm583_vm0, %v4398_v12, 0.0  ;;  %v2337_v17 = vadd.f32 %v2336_v34, %v2335_v30  ;;  %vm2413_vm6 = vcmask 1045509  }
 0x208   : > { %v2310_v37 = vadd.f32 %v2309_v22, %v2308_v58  ;;  %v2353_v56 = vsel %vm583_vm0, %v2192_v23, 0.0  ;;  %vm2415_vm7 = vcmask 1046534   ;;  %vm2417_vm8 = vcmask 1047559  }
 0x209   : > { %v2354_v60 = vadd.f32 %v2353_v56, %v2352_v63  ;;  %v2338_v61 = vrot.slane %v2337_v17, 1  ;;  %vm2463_vm9 = vcmask 261120  }
 0x20a   : > { %v2312_v50 = vadd.f32 %v2311_v20, %v2310_v37 }
 0x20b   : > { %v2355_v41 = vrot.slane %v2354_v60, 4  ;;  %v2339_v28 = vadd.f32 %v2338_v61, %v2337_v17 }
 0x20c   : > { %v2313_v38 = vrot.slane %v2312_v50, 4 }
 0x20d   : > { %v2356_v53 = vadd.f32 %v2355_v41, %v2354_v60  ;;  %v2367_v15 = vmul.f32 0.015625, %v2339_v28 }
 0x20e   : > { %v2314_v29 = vadd.f32 %v2313_v38, %v2312_v50 }
 0x20f   : > { %v2357_v10 = vrot.slane %v2356_v53, 2  ;;  %v2375_v30 = vpack.c.bf16 %v2367_v15, %v2367_v15 }
 0x210   : > { %v2315_v54 = vrot.slane %v2314_v29, 2 }
 0x211   : > { %v2358_v40 = vadd.f32 %v2357_v10, %v2356_v53  ;;  %v2403_v36 = vunpack.c.l.b16 %v2375_v30 }
 0x212   : > { %v2316_v16 = vadd.f32 %v2315_v54, %v2314_v29 }
 0x213   : > { %v2359_v42 = vrot.slane %v2358_v40, 1 }
 0x214   : > { %v2317_v55 = vrot.slane %v2316_v16, 1 }
 0x215   : > { %v2360_v26 = vadd.f32 %v2359_v42, %v2358_v40 }
 0x216   : > { %v2318_v39 = vadd.f32 %v2317_v55, %v2316_v16 }
 0x217   : > { %v2368_v18 = vmul.f32 0.015625, %v2360_v26 }
 0x218   : > { %v2366_v12 = vmul.f32 0.015625, %v2318_v39 }
 0x219   : > { %v2376_v24 = vpack.c.bf16 %v2368_v18, %v2368_v18 }
 0x21a   : > { %v2374_v4 = vpack.c.bf16 %v2366_v12, %v2366_v12 }
 0x21b   : > { %v2404_v25 = vunpack.c.l.b16 %v2376_v24 }
 0x21c   : > { %v2402_v14 = vunpack.c.l.b16 %v2374_v4 }
 0x21e   : > { %v2414_v33 = vsel %vm2413_vm6, %v2402_v14, %v2412_v45 }
 0x21f   : > { %v2416_v32 = vsel %vm2415_vm7, %v2403_v36, %v2414_v33 }
 0x220   : > { %v2418_v44 = vsel %vm2417_vm8, %v2404_v25, %v2416_v32 }
 0x221   : > { %v2419_v51 = vpack.c.b16 %v2418_v44, %v2418_v44 }
 0x223   : > { %2851 = vmatmul.msk.bf16.vlgmr.msrb.gmra.mxu1 %vm583_vm0, %v2419_v51 }
 0x2a0   : > { %v2456_v47 = vpop.f32.mrf.mxu1 }
 0x2a1   : > { %v2457_v62 = vadd.f32 %v2949_v57, %v2456_v47 }
 0x2a3   : > { %v2461_v59 = vmul.f32 0.1, %v2457_v62  ;;  %vm2460_vm0 = vcmp.ge.f32.partialorder %v2457_v62, 0.0 }
 0x2a5   : > { %v2462_v43 = vsel %vm2460_vm0, %v2457_v62, %v2461_v59 }
 0x2a6   : > { %2464 = vst.msk [vmem:[%s310_s27] sm:$0xff] %vm2463_vm9, %v2462_v43  ;;  %v2469_v5 = vmul.f32 %v2950_v0, %v2462_v43 }
 0x2a7   : > { %3237 = shalt.err (!%p3234_p3)
}
 0x2a8   : > { %2909 = dma.vmem_to_hbm [thread:$0]  (%p3360_p5), %s2501_s28, 128, %s2503_s11, %s2485_s20   ;;  %v2458_v34 = vpop.f32.mrf.mxu1  ;;  %v2470_v1 = vsel %vm2463_vm9, %v2469_v5, 0.0  ;;  %v2951_v7 = vld [vmem:[#allocation2] ss:$0 sm:$0xff]  ;;  %vm2478_vm10 = vcmask 7168  }
 0x2a9   : > { %2471 = vadd.xlane.f32.xlu0 %v2470_v1  ;;  %p318_p4 = scmp.lt.s32.totalorder %s3343_s6, 1 }
 0x2ab   : > { %s5660_s6 = smov (!%p318_p4, %s3343_s6), 1 }
 0x2ac   : > { %s2594_s19 = sshll.u32 %s5660_s6, 3 }
 0x2ad   : > { %s321_s14 = scalar_lea.vmem %s5455_s7, %s2594_s19 }
 0x31c   : > { %v2472_v21 = vpop.xlane.xlu0 %2471 }
 0x31d   : > { %v2477_v6 = vadd.f32 %v2951_v7, %v2472_v21 }
 0x31f   : > { %2479 = vst.msk [vmem:[%s321_s14] sm:$0xff] %vm2478_vm10, %v2477_v6 }
 0x320 PF: > { %p2915_p5 = scmp.ge.s32.totalorder %s3272_s10, 2  ;;  %s2521_s16 = sand.u32 1, %s3260_s29  }
 0x321   : > { %s2522_s28 = scalar_lea.sflag [#allocation4], %s2521_s16 }
 0x322   : > { %p2912_p7 = pnand %p2915_p5, %p3364_p6 }
 0x324   : > { %p2913_p8 = pneg %p2912_p7 }
 0x326   : > { %3255 = dma.done.wait (%p2913_p8), %s2522_s28, 128  }
 0x327   : > { %3257 = vsyncadd (%p2913_p8), %s2522_s28, 4294967168  ;;  %p21_p9 = scmp.ge.s32.totalorder %s3347_s12, 4   ;;  %s5655_s29 = smov %s3264_s30 }
 0x328   : > { %s5656_s30 = smov %s3268_s9  ;;  %s5657_s9 = smov %s3358_s15 }
 0x329   : > { %s5658_s10 = smov %s3347_s12  ;;  %23 = sbr.rel (!%p21_p9) target bundleno = 6 (0x6), region = 95 }
 0x32e   :  { %2528 = vsyncpa [#allocation4], 1 }
 0x32f   :  { %2530 = vsyncpa [#allocation4 + $0x1], 1 }

</bundles_post_ra>
